<compile_context>
chip_gen: v6e
topology: v6e:2x2x1
jax: 0.10.0
libtpu: 0.0.40
codegen_flags: <defaults>
</compile_context>

<pallas_src>
from functools import partial

import jax
import jax.numpy as jnp
from jax.experimental import pallas as pl
from jax.experimental.pallas import tpu as pltpu


def _round_up(x, m):
    return ((x + m - 1) // m) * m


def _lstm_recurrence_kernel(zx_ref, wh_ref, h_out_ref, h_sc, c_sc, *,
                            seq_len, unroll):
    """One (batch_block, time_chunk) grid step of the LSTM recurrence.

    zx_ref : (Tt, Bb, 4*Hp) bf16   precomputed x@Wx + b (gate order [g,i,f,o])
    wh_ref : (Hp, 4*Hp)     bf16   hidden-to-gates weights
    h_out_ref : (Bb, Hp)    f32    final hidden state (written on last chunk)
    h_sc, c_sc : (Bb, Hp)   f32    VMEM-resident recurrent state
    """
    ti = pl.program_id(1)
    n_t = pl.num_programs(1)
    Tt, Bb, four_hp = zx_ref.shape
    Hp = four_hp // 4

    @pl.when(ti == 0)
    def _():
        h_sc[...] = jnp.zeros_like(h_sc)
        c_sc[...] = jnp.zeros_like(c_sc)

    def step(t, carry):
        h, c = carry
        h_bf = h.astype(jnp.bfloat16)
        zt = zx_ref[t]                                  # (Bb, 4*Hp) bf16

        def gate(k, act):
            # Per-gate dot straight from VMEM; activation starts as soon as
            # this gate's slice of z is available (EUP overlaps later MXU work).
            zk = zt[:, k * Hp:(k + 1) * Hp].astype(jnp.float32) + jnp.dot(
                h_bf, wh_ref[:, k * Hp:(k + 1) * Hp],
                preferred_element_type=jnp.float32)
            return act(zk)

        g = gate(0, jnp.tanh)
        i = gate(1, jax.nn.sigmoid)
        f = gate(2, jax.nn.sigmoid)
        o = gate(3, jax.nn.sigmoid)
        c_new = g * i + c * f
        h_new = jnp.tanh(c_new) * o

        # Mask out padded time steps in the final (partial) chunk.
        valid = (ti * Tt + t) < seq_len
        h = jnp.where(valid, h_new, h)
        c = jnp.where(valid, c_new, c)
        return h, c

    h, c = jax.lax.fori_loop(0, Tt, step, (h_sc[...], c_sc[...]),
                             unroll=min(unroll, Tt))
    h_sc[...] = h
    c_sc[...] = c

    @pl.when(ti == n_t - 1)
    def _():
        h_out_ref[...] = h


def lstm_forward(x, params, *, time_chunk_budget_bytes=2 << 20, unroll=8):
    """x: (batch, seq, input_dim) float32. Returns y: (batch, output_dim)."""
    B, T, N = x.shape
    Wx, Wh, b, Wp, bp = params          # (N,4H), (H,4H), (1,4H), (H,M), (1,M)
    H = Wh.shape[0]

    Hp = max(128, _round_up(H, 128))    # lane alignment (per gate block)
    Bp = max(16, _round_up(B, 16))      # bf16 sublane tile is (16, 128)

    # Batch blocking: split into two parallel blocks when big enough so the
    # batch-parallel grid axis can use both TensorCores on v7x.
    if Bp >= 32:
        Bb = _round_up((Bp + 1) // 2, 16)
        Bp = 2 * Bb
    else:
        Bb = Bp
    n_b = Bp // Bb

    # --- zero-pad each gate block of the fused weights/bias to Hp lanes ------
    def pad_gates_last(w):              # (..., 4H) -> (..., 4Hp)
        w4 = w.reshape(w.shape[:-1] + (4, H))
        w4 = jnp.pad(w4, [(0, 0)] * (w4.ndim - 1) + [(0, Hp - H)])
        return w4.reshape(w.shape[:-1] + (4 * Hp,))

    Wx_p = pad_gates_last(Wx)                                   # (N, 4Hp)
    b_p = pad_gates_last(b)                                     # (1, 4Hp)
    Wh_p = jnp.pad(pad_gates_last(Wh), ((0, Hp - H), (0, 0)))   # (Hp, 4Hp)

    # --- pad batch on the SMALL tensor x, then hoisted input projection ------
    x_p = jnp.pad(x, ((0, Bp - B), (0, 0), (0, 0)))             # (Bp, T, N)
    zx = jnp.einsum("btn,nk->tbk", x_p, Wx_p) + b_p             # (T, Bp, 4Hp) f32
    zx = zx.astype(jnp.bfloat16)                                # bf16 operands,
    Wh_b = Wh_p.astype(jnp.bfloat16)                            # f32 accumulate

    # --- time chunking (sized so double-buffered chunks fit v7x VMEM) --------
    bytes_per_step = Bb * 4 * Hp * 2                            # bf16
    Tt = int(max(1, min(T, time_chunk_budget_bytes // bytes_per_step)))
    n_t = -(-T // Tt)
    if n_t * Tt != T:
        zx = jnp.pad(zx, ((0, n_t * Tt - T), (0, 0), (0, 0)))

    zx_chunk_bytes = Tt * Bb * 4 * Hp * 2
    wh_bytes = Hp * 4 * Hp * 2
    out_bytes = Bb * Hp * 4
    scratch_bytes = 2 * Bb * Hp * 4
    vmem_needed = 2 * zx_chunk_bytes + 2 * wh_bytes + 2 * out_bytes + scratch_bytes
    vmem_limit_bytes = int(min(100 << 20, max(16 << 20, vmem_needed + (4 << 20))))

    # --- pipelined Pallas kernel: only the sequential recurrence -------------
    h_pad = pl.pallas_call(
        partial(_lstm_recurrence_kernel, seq_len=T, unroll=unroll),
        out_shape=jax.ShapeDtypeStruct((Bp, Hp), jnp.float32),
        grid_spec=pltpu.PrefetchScalarGridSpec(
            num_scalar_prefetch=0,
            grid=(n_b, n_t),
            in_specs=[
                pl.BlockSpec((Tt, Bb, 4 * Hp), lambda bi, ti: (ti, bi, 0)),
                pl.BlockSpec((Hp, 4 * Hp), lambda bi, ti: (0, 0)),
            ],
            out_specs=pl.BlockSpec((Bb, Hp), lambda bi, ti: (bi, 0)),
            scratch_shapes=[pltpu.VMEM((Bb, Hp), jnp.float32),
                            pltpu.VMEM((Bb, Hp), jnp.float32)],
        ),
        compiler_params=pltpu.CompilerParams(
            dimension_semantics=("parallel", "arbitrary"),
            vmem_limit_bytes=vmem_limit_bytes,
        ),
    )(zx, Wh_b)

    # --- final projection outside the kernel (used once) ---------------------
    h = h_pad[:B, :H]
    return h @ Wp + bp


def init_params(key, input_dim, hidden_dim, output_dim):
    """Deterministic init mimicking nn.Linear default (uniform +-1/sqrt(fan_in)).
    Weights stored pre-transposed ((in, out)) and gate-fused in [g,i,f,o] order."""
    ks = jax.random.split(key, 10)
    bx = 1.0 / jnp.sqrt(input_dim)
    bh = 1.0 / jnp.sqrt(hidden_dim)

    def u(k, shape, bound):
        return jax.random.uniform(k, shape, jnp.float32, -bound, bound)

    wgx, wix, wfx, wox = (u(ks[i], (input_dim, hidden_dim), bx) for i in range(4))
    bg, bi, bf, bo = (u(ks[4 + i], (hidden_dim,), bx) for i in range(4))
    kh = jax.random.split(ks[8], 4)
    wgh, wih, wfh, woh = (u(kh[i], (hidden_dim, hidden_dim), bh) for i in range(4))
    kp = jax.random.split(ks[9], 2)
    wp = u(kp[0], (hidden_dim, output_dim), bh)
    bp = u(kp[1], (output_dim,), bh)

    Wx = jnp.concatenate([wgx, wix, wfx, wox], axis=1)          # (N, 4H)
    Wh = jnp.concatenate([wgh, wih, wfh, woh], axis=1)          # (H, 4H)
    b = jnp.concatenate([bg, bi, bf, bo], axis=0)[None, :]      # (1, 4H)
    return Wx, Wh, b, wp, bp[None, :]


def lstm_reference_f32(x, params):
    """Pure-JAX f32 reference matching the PyTorch forward semantics."""
    Wx, Wh, b, Wp, bp = params
    B = x.shape[0]
    H = Wh.shape[0]
    h = jnp.zeros((B, H), jnp.float32)
    c = jnp.zeros((B, H), jnp.float32)
    for t in range(x.shape[1]):
        z = x[:, t, :] @ Wx + h @ Wh + b
        g = jnp.tanh(z[:, 0 * H:1 * H])
        i = jax.nn.sigmoid(z[:, 1 * H:2 * H])
        f = jax.nn.sigmoid(z[:, 2 * H:3 * H])
        o = jax.nn.sigmoid(z[:, 3 * H:4 * H])
        c = g * i + c * f
        h = jnp.tanh(c) * o
    return h @ Wp + bp


def lstm_reference_mixed(x, params):
    """Reference reproducing the kernel's exact numerics (bf16 operands, f32 accum)."""
    Wx, Wh, b, Wp, bp = params
    B = x.shape[0]
    H = Wh.shape[0]
    zx = (jnp.einsum("btn,nk->tbk", x, Wx) + b).astype(jnp.bfloat16)
    Wh_b = Wh.astype(jnp.bfloat16)
    h = jnp.zeros((B, H), jnp.float32)
    c = jnp.zeros((B, H), jnp.float32)
    for t in range(x.shape[1]):
        z = zx[t].astype(jnp.float32) + jnp.dot(
            h.astype(jnp.bfloat16), Wh_b, preferred_element_type=jnp.float32)
        g = jnp.tanh(z[:, 0 * H:1 * H])
        i = jax.nn.sigmoid(z[:, 1 * H:2 * H])
        f = jax.nn.sigmoid(z[:, 2 * H:3 * H])
        o = jax.nn.sigmoid(z[:, 3 * H:4 * H])
        c = g * i + c * f
        h = jnp.tanh(c) * o
    return h @ Wp + bp


if __name__ == "__main__":
    batch, seq_length, input_dim, hidden_dim, output_dim = 2, 8, 4, 32, 8

    key = jax.random.PRNGKey(0)
    k_x, k_p = jax.random.split(key)
    x = jax.random.normal(k_x, (batch, seq_length, input_dim), jnp.float32)
    params = init_params(k_p, input_dim, hidden_dim, output_dim)

    y = lstm_forward(x, params)
    jax.block_until_ready(y)
    assert y.shape == (batch, output_dim)

    # Tight check against a reference with identical mixed-precision numerics.
    y_mixed = lstm_reference_mixed(x, params)
    assert jnp.allclose(y, y_mixed, atol=1e-4, rtol=1e-4), \
        f"mixed-precision mismatch: {jnp.max(jnp.abs(y - y_mixed))}"

    # Semantics check against the full-f32 PyTorch-style reference
    # (tolerance sized for bf16 matmul operands).
    y_f32 = lstm_reference_f32(x, params)
    assert jnp.allclose(y, y_f32, atol=5e-2, rtol=5e-2), \
        f"f32 reference mismatch: {jnp.max(jnp.abs(y - y_f32))}"

    print("KERNEL_OK")
</pallas_src>

<mosaic_0001>
module attributes {stable_mosaic.version = 11 : i64} {
  func.func @_lstm_recurrence_kernel(%arg0: i32, %arg1: i32, %arg2: memref<8x16x512xbf16, #tpu.memory_space<vmem>>, %arg3: memref<128x512xbf16, #tpu.memory_space<vmem>>, %arg4: memref<16x128xf32, #tpu.memory_space<vmem>>, %arg5: memref<16x128xf32, #tpu.memory_space<vmem>>, %arg6: memref<16x128xf32, #tpu.memory_space<vmem>>) attributes {dimension_semantics = [#tpu.dimension_semantics<parallel>, #tpu.dimension_semantics<arbitrary>], iteration_bounds = array<i64: 1, 1>, scalar_prefetch = 0 : i64, scratch_operands = 2 : i64, tpu.core_type = #tpu.core_type<tc>, window_params = [{transform_indices = @transform_0, window_bounds = array<i64: 8, 16, 512>}, {pipeline_mode = #tpu.pipeline_mode<synchronous>, transform_indices = @transform_1, window_bounds = array<i64: 128, 512>}, {transform_indices = @transform_2, window_bounds = array<i64: 16, 128>}]} {
    %c0_i32 = arith.constant 0 : i32
    %0 = arith.cmpi eq, %arg1, %c0_i32 : i32
    %1 = arith.extui %0 : i1 to i32
    %c0_i32_0 = arith.constant 0 : i32
    %2 = arith.cmpi ne, %1, %c0_i32_0 : i32
    scf.if %2 {
      %cst_159 = arith.constant 0.000000e+00 : f32
      %410 = vector.broadcast %cst_159 : f32 to vector<16x128xf32>
      %c0_160 = arith.constant 0 : index
      %c0_161 = arith.constant 0 : index
      %411 = vector.load %arg5[%c0_160, %c0_161] : memref<16x128xf32, #tpu.memory_space<vmem>>, vector<16x128xf32>
      tpu.vector_store %arg5[%c0_160, %c0_161], %410 {strides = array<i32>} : memref<16x128xf32, #tpu.memory_space<vmem>>, vector<16x128xf32>,
      %cst_162 = arith.constant 0.000000e+00 : f32
      %412 = vector.broadcast %cst_162 : f32 to vector<16x128xf32>
      %c0_163 = arith.constant 0 : index
      %c0_164 = arith.constant 0 : index
      %413 = vector.load %arg6[%c0_163, %c0_164] : memref<16x128xf32, #tpu.memory_space<vmem>>, vector<16x128xf32>
      tpu.vector_store %arg6[%c0_163, %c0_164], %412 {strides = array<i32>} : memref<16x128xf32, #tpu.memory_space<vmem>>, vector<16x128xf32>,
    } else {
    }
    %c0 = arith.constant 0 : index
    %c0_1 = arith.constant 0 : index
    %3 = vector.load %arg5[%c0, %c0_1] : memref<16x128xf32, #tpu.memory_space<vmem>>, vector<16x128xf32>
    %c0_2 = arith.constant 0 : index
    %c0_3 = arith.constant 0 : index
    %4 = vector.load %arg6[%c0_2, %c0_3] : memref<16x128xf32, #tpu.memory_space<vmem>>, vector<16x128xf32>
    %c0_i32_4 = arith.constant 0 : i32
    %5 = arith.truncf %3 : vector<16x128xf32> to vector<16x128xbf16>
    %6 = arith.index_cast %c0_i32_4 : i32 to index
    %c0_5 = arith.constant 0 : index
    %c0_6 = arith.constant 0 : index
    %7 = vector.load %arg2[%6, %c0_5, %c0_6] : memref<8x16x512xbf16, #tpu.memory_space<vmem>>, vector<1x16x512xbf16>
    %8 = vector.shape_cast %7 : vector<1x16x512xbf16> to vector<16x512xbf16>
    %9 = vector.extract_strided_slice %8 {offsets = [0, 0], sizes = [16, 128], strides = [1, 1]} : vector<16x512xbf16> to vector<16x128xbf16>
    %10 = arith.extf %9 : vector<16x128xbf16> to vector<16x128xf32>
    %c0_7 = arith.constant 0 : index
    %c0_8 = arith.constant 0 : index
    %11 = vector.load %arg3[%c0_7, %c0_8] : memref<128x512xbf16, #tpu.memory_space<vmem>>, vector<128x128xbf16>
    %cst = arith.constant dense<0.000000e+00> : vector<16x128xf32>
    %12 = tpu.matmul %5, %11, %cst {dimension_numbers = #tpu.dot_dimension_numbers<[1], [0], [0], [1], [0, 0, 1, 1], [], []>} : vector<16x128xbf16>, vector<128x128xbf16>, vector<16x128xf32> -> vector<16x128xf32>
    %13 = arith.addf %10, %12 : vector<16x128xf32>
    %14 = math.tanh %13 : vector<16x128xf32>
    %15 = vector.extract_strided_slice %8 {offsets = [0, 128], sizes = [16, 128], strides = [1, 1]} : vector<16x512xbf16> to vector<16x128xbf16>
    %16 = arith.extf %15 : vector<16x128xbf16> to vector<16x128xf32>
    %c0_9 = arith.constant 0 : index
    %c128 = arith.constant 128 : index
    %17 = vector.load %arg3[%c0_9, %c128] : memref<128x512xbf16, #tpu.memory_space<vmem>>, vector<128x128xbf16>
    %cst_10 = arith.constant dense<0.000000e+00> : vector<16x128xf32>
    %18 = tpu.matmul %5, %17, %cst_10 {dimension_numbers = #tpu.dot_dimension_numbers<[1], [0], [0], [1], [0, 0, 1, 1], [], []>} : vector<16x128xbf16>, vector<128x128xbf16>, vector<16x128xf32> -> vector<16x128xf32>
    %19 = arith.addf %16, %18 : vector<16x128xf32>
    %20 = arith.negf %19 : vector<16x128xf32>
    %21 = math.exp %20 : vector<16x128xf32>
    %cst_11 = arith.constant 1.000000e+00 : f32
    %22 = vector.broadcast %cst_11 : f32 to vector<16x128xf32>
    %23 = arith.addf %22, %21 : vector<16x128xf32>
    %24 = arith.divf %22, %23 : vector<16x128xf32>
    %25 = vector.extract_strided_slice %8 {offsets = [0, 256], sizes = [16, 128], strides = [1, 1]} : vector<16x512xbf16> to vector<16x128xbf16>
    %26 = arith.extf %25 : vector<16x128xbf16> to vector<16x128xf32>
    %c0_12 = arith.constant 0 : index
    %c256 = arith.constant 256 : index
    %27 = vector.load %arg3[%c0_12, %c256] : memref<128x512xbf16, #tpu.memory_space<vmem>>, vector<128x128xbf16>
    %cst_13 = arith.constant dense<0.000000e+00> : vector<16x128xf32>
    %28 = tpu.matmul %5, %27, %cst_13 {dimension_numbers = #tpu.dot_dimension_numbers<[1], [0], [0], [1], [0, 0, 1, 1], [], []>} : vector<16x128xbf16>, vector<128x128xbf16>, vector<16x128xf32> -> vector<16x128xf32>
    %29 = arith.addf %26, %28 : vector<16x128xf32>
    %30 = arith.negf %29 : vector<16x128xf32>
    %31 = math.exp %30 : vector<16x128xf32>
    %cst_14 = arith.constant 1.000000e+00 : f32
    %32 = vector.broadcast %cst_14 : f32 to vector<16x128xf32>
    %33 = arith.addf %32, %31 : vector<16x128xf32>
    %34 = arith.divf %32, %33 : vector<16x128xf32>
    %35 = vector.extract_strided_slice %8 {offsets = [0, 384], sizes = [16, 128], strides = [1, 1]} : vector<16x512xbf16> to vector<16x128xbf16>
    %36 = arith.extf %35 : vector<16x128xbf16> to vector<16x128xf32>
    %c0_15 = arith.constant 0 : index
    %c384 = arith.constant 384 : index
    %37 = vector.load %arg3[%c0_15, %c384] : memref<128x512xbf16, #tpu.memory_space<vmem>>, vector<128x128xbf16>
    %cst_16 = arith.constant dense<0.000000e+00> : vector<16x128xf32>
    %38 = tpu.matmul %5, %37, %cst_16 {dimension_numbers = #tpu.dot_dimension_numbers<[1], [0], [0], [1], [0, 0, 1, 1], [], []>} : vector<16x128xbf16>, vector<128x128xbf16>, vector<16x128xf32> -> vector<16x128xf32>
    %39 = arith.addf %36, %38 : vector<16x128xf32>
    %40 = arith.negf %39 : vector<16x128xf32>
    %41 = math.exp %40 : vector<16x128xf32>
    %cst_17 = arith.constant 1.000000e+00 : f32
    %42 = vector.broadcast %cst_17 : f32 to vector<16x128xf32>
    %43 = arith.addf %42, %41 : vector<16x128xf32>
    %44 = arith.divf %42, %43 : vector<16x128xf32>
    %45 = arith.mulf %14, %24 : vector<16x128xf32>
    %46 = arith.mulf %4, %34 : vector<16x128xf32>
    %47 = arith.addf %45, %46 : vector<16x128xf32>
    %48 = math.tanh %47 : vector<16x128xf32>
    %49 = arith.mulf %48, %44 : vector<16x128xf32>
    %c8_i32 = arith.constant 8 : i32
    %50 = arith.muli %arg1, %c8_i32 : i32
    %51 = arith.addi %50, %c0_i32_4 : i32
    %c8_i32_18 = arith.constant 8 : i32
    %52 = arith.cmpi slt, %51, %c8_i32_18 : i32
    %53 = arith.select %52, %49, %3 : vector<16x128xf32>
    %54 = arith.select %52, %47, %4 : vector<16x128xf32>
    %c1_i32 = arith.constant 1 : i32
    %55 = arith.truncf %53 : vector<16x128xf32> to vector<16x128xbf16>
    %56 = arith.index_cast %c1_i32 : i32 to index
    %c0_19 = arith.constant 0 : index
    %c0_20 = arith.constant 0 : index
    %57 = vector.load %arg2[%56, %c0_19, %c0_20] : memref<8x16x512xbf16, #tpu.memory_space<vmem>>, vector<1x16x512xbf16>
    %58 = vector.shape_cast %57 : vector<1x16x512xbf16> to vector<16x512xbf16>
    %59 = vector.extract_strided_slice %58 {offsets = [0, 0], sizes = [16, 128], strides = [1, 1]} : vector<16x512xbf16> to vector<16x128xbf16>
    %60 = arith.extf %59 : vector<16x128xbf16> to vector<16x128xf32>
    %c0_21 = arith.constant 0 : index
    %c0_22 = arith.constant 0 : index
    %61 = vector.load %arg3[%c0_21, %c0_22] : memref<128x512xbf16, #tpu.memory_space<vmem>>, vector<128x128xbf16>
    %cst_23 = arith.constant dense<0.000000e+00> : vector<16x128xf32>
    %62 = tpu.matmul %55, %61, %cst_23 {dimension_numbers = #tpu.dot_dimension_numbers<[1], [0], [0], [1], [0, 0, 1, 1], [], []>} : vector<16x128xbf16>, vector<128x128xbf16>, vector<16x128xf32> -> vector<16x128xf32>
    %63 = arith.addf %60, %62 : vector<16x128xf32>
    %64 = math.tanh %63 : vector<16x128xf32>
    %65 = vector.extract_strided_slice %58 {offsets = [0, 128], sizes = [16, 128], strides = [1, 1]} : vector<16x512xbf16> to vector<16x128xbf16>
    %66 = arith.extf %65 : vector<16x128xbf16> to vector<16x128xf32>
    %c0_24 = arith.constant 0 : index
    %c128_25 = arith.constant 128 : index
    %67 = vector.load %arg3[%c0_24, %c128_25] : memref<128x512xbf16, #tpu.memory_space<vmem>>, vector<128x128xbf16>
    %cst_26 = arith.constant dense<0.000000e+00> : vector<16x128xf32>
    %68 = tpu.matmul %55, %67, %cst_26 {dimension_numbers = #tpu.dot_dimension_numbers<[1], [0], [0], [1], [0, 0, 1, 1], [], []>} : vector<16x128xbf16>, vector<128x128xbf16>, vector<16x128xf32> -> vector<16x128xf32>
    %69 = arith.addf %66, %68 : vector<16x128xf32>
    %70 = arith.negf %69 : vector<16x128xf32>
    %71 = math.exp %70 : vector<16x128xf32>
    %cst_27 = arith.constant 1.000000e+00 : f32
    %72 = vector.broadcast %cst_27 : f32 to vector<16x128xf32>
    %73 = arith.addf %72, %71 : vector<16x128xf32>
    %74 = arith.divf %72, %73 : vector<16x128xf32>
    %75 = vector.extract_strided_slice %58 {offsets = [0, 256], sizes = [16, 128], strides = [1, 1]} : vector<16x512xbf16> to vector<16x128xbf16>
    %76 = arith.extf %75 : vector<16x128xbf16> to vector<16x128xf32>
    %c0_28 = arith.constant 0 : index
    %c256_29 = arith.constant 256 : index
    %77 = vector.load %arg3[%c0_28, %c256_29] : memref<128x512xbf16, #tpu.memory_space<vmem>>, vector<128x128xbf16>
    %cst_30 = arith.constant dense<0.000000e+00> : vector<16x128xf32>
    %78 = tpu.matmul %55, %77, %cst_30 {dimension_numbers = #tpu.dot_dimension_numbers<[1], [0], [0], [1], [0, 0, 1, 1], [], []>} : vector<16x128xbf16>, vector<128x128xbf16>, vector<16x128xf32> -> vector<16x128xf32>
    %79 = arith.addf %76, %78 : vector<16x128xf32>
    %80 = arith.negf %79 : vector<16x128xf32>
    %81 = math.exp %80 : vector<16x128xf32>
    %cst_31 = arith.constant 1.000000e+00 : f32
    %82 = vector.broadcast %cst_31 : f32 to vector<16x128xf32>
    %83 = arith.addf %82, %81 : vector<16x128xf32>
    %84 = arith.divf %82, %83 : vector<16x128xf32>
    %85 = vector.extract_strided_slice %58 {offsets = [0, 384], sizes = [16, 128], strides = [1, 1]} : vector<16x512xbf16> to vector<16x128xbf16>
    %86 = arith.extf %85 : vector<16x128xbf16> to vector<16x128xf32>
    %c0_32 = arith.constant 0 : index
    %c384_33 = arith.constant 384 : index
    %87 = vector.load %arg3[%c0_32, %c384_33] : memref<128x512xbf16, #tpu.memory_space<vmem>>, vector<128x128xbf16>
    %cst_34 = arith.constant dense<0.000000e+00> : vector<16x128xf32>
    %88 = tpu.matmul %55, %87, %cst_34 {dimension_numbers = #tpu.dot_dimension_numbers<[1], [0], [0], [1], [0, 0, 1, 1], [], []>} : vector<16x128xbf16>, vector<128x128xbf16>, vector<16x128xf32> -> vector<16x128xf32>
    %89 = arith.addf %86, %88 : vector<16x128xf32>
    %90 = arith.negf %89 : vector<16x128xf32>
    %91 = math.exp %90 : vector<16x128xf32>
    %cst_35 = arith.constant 1.000000e+00 : f32
    %92 = vector.broadcast %cst_35 : f32 to vector<16x128xf32>
    %93 = arith.addf %92, %91 : vector<16x128xf32>
    %94 = arith.divf %92, %93 : vector<16x128xf32>
    %95 = arith.mulf %64, %74 : vector<16x128xf32>
    %96 = arith.mulf %54, %84 : vector<16x128xf32>
    %97 = arith.addf %95, %96 : vector<16x128xf32>
    %98 = math.tanh %97 : vector<16x128xf32>
    %99 = arith.mulf %98, %94 : vector<16x128xf32>
    %c8_i32_36 = arith.constant 8 : i32
    %100 = arith.muli %arg1, %c8_i32_36 : i32
    %101 = arith.addi %100, %c1_i32 : i32
    %c8_i32_37 = arith.constant 8 : i32
    %102 = arith.cmpi slt, %101, %c8_i32_37 : i32
    %103 = arith.select %102, %99, %53 : vector<16x128xf32>
    %104 = arith.select %102, %97, %54 : vector<16x128xf32>
    %c2_i32 = arith.constant 2 : i32
    %105 = arith.truncf %103 : vector<16x128xf32> to vector<16x128xbf16>
    %106 = arith.index_cast %c2_i32 : i32 to index
    %c0_38 = arith.constant 0 : index
    %c0_39 = arith.constant 0 : index
    %107 = vector.load %arg2[%106, %c0_38, %c0_39] : memref<8x16x512xbf16, #tpu.memory_space<vmem>>, vector<1x16x512xbf16>
    %108 = vector.shape_cast %107 : vector<1x16x512xbf16> to vector<16x512xbf16>
    %109 = vector.extract_strided_slice %108 {offsets = [0, 0], sizes = [16, 128], strides = [1, 1]} : vector<16x512xbf16> to vector<16x128xbf16>
    %110 = arith.extf %109 : vector<16x128xbf16> to vector<16x128xf32>
    %c0_40 = arith.constant 0 : index
    %c0_41 = arith.constant 0 : index
    %111 = vector.load %arg3[%c0_40, %c0_41] : memref<128x512xbf16, #tpu.memory_space<vmem>>, vector<128x128xbf16>
    %cst_42 = arith.constant dense<0.000000e+00> : vector<16x128xf32>
    %112 = tpu.matmul %105, %111, %cst_42 {dimension_numbers = #tpu.dot_dimension_numbers<[1], [0], [0], [1], [0, 0, 1, 1], [], []>} : vector<16x128xbf16>, vector<128x128xbf16>, vector<16x128xf32> -> vector<16x128xf32>
    %113 = arith.addf %110, %112 : vector<16x128xf32>
    %114 = math.tanh %113 : vector<16x128xf32>
    %115 = vector.extract_strided_slice %108 {offsets = [0, 128], sizes = [16, 128], strides = [1, 1]} : vector<16x512xbf16> to vector<16x128xbf16>
    %116 = arith.extf %115 : vector<16x128xbf16> to vector<16x128xf32>
    %c0_43 = arith.constant 0 : index
    %c128_44 = arith.constant 128 : index
    %117 = vector.load %arg3[%c0_43, %c128_44] : memref<128x512xbf16, #tpu.memory_space<vmem>>, vector<128x128xbf16>
    %cst_45 = arith.constant dense<0.000000e+00> : vector<16x128xf32>
    %118 = tpu.matmul %105, %117, %cst_45 {dimension_numbers = #tpu.dot_dimension_numbers<[1], [0], [0], [1], [0, 0, 1, 1], [], []>} : vector<16x128xbf16>, vector<128x128xbf16>, vector<16x128xf32> -> vector<16x128xf32>
    %119 = arith.addf %116, %118 : vector<16x128xf32>
    %120 = arith.negf %119 : vector<16x128xf32>
    %121 = math.exp %120 : vector<16x128xf32>
    %cst_46 = arith.constant 1.000000e+00 : f32
    %122 = vector.broadcast %cst_46 : f32 to vector<16x128xf32>
    %123 = arith.addf %122, %121 : vector<16x128xf32>
    %124 = arith.divf %122, %123 : vector<16x128xf32>
    %125 = vector.extract_strided_slice %108 {offsets = [0, 256], sizes = [16, 128], strides = [1, 1]} : vector<16x512xbf16> to vector<16x128xbf16>
    %126 = arith.extf %125 : vector<16x128xbf16> to vector<16x128xf32>
    %c0_47 = arith.constant 0 : index
    %c256_48 = arith.constant 256 : index
    %127 = vector.load %arg3[%c0_47, %c256_48] : memref<128x512xbf16, #tpu.memory_space<vmem>>, vector<128x128xbf16>
    %cst_49 = arith.constant dense<0.000000e+00> : vector<16x128xf32>
    %128 = tpu.matmul %105, %127, %cst_49 {dimension_numbers = #tpu.dot_dimension_numbers<[1], [0], [0], [1], [0, 0, 1, 1], [], []>} : vector<16x128xbf16>, vector<128x128xbf16>, vector<16x128xf32> -> vector<16x128xf32>
    %129 = arith.addf %126, %128 : vector<16x128xf32>
    %130 = arith.negf %129 : vector<16x128xf32>
    %131 = math.exp %130 : vector<16x128xf32>
    %cst_50 = arith.constant 1.000000e+00 : f32
    %132 = vector.broadcast %cst_50 : f32 to vector<16x128xf32>
    %133 = arith.addf %132, %131 : vector<16x128xf32>
    %134 = arith.divf %132, %133 : vector<16x128xf32>
    %135 = vector.extract_strided_slice %108 {offsets = [0, 384], sizes = [16, 128], strides = [1, 1]} : vector<16x512xbf16> to vector<16x128xbf16>
    %136 = arith.extf %135 : vector<16x128xbf16> to vector<16x128xf32>
    %c0_51 = arith.constant 0 : index
    %c384_52 = arith.constant 384 : index
    %137 = vector.load %arg3[%c0_51, %c384_52] : memref<128x512xbf16, #tpu.memory_space<vmem>>, vector<128x128xbf16>
    %cst_53 = arith.constant dense<0.000000e+00> : vector<16x128xf32>
    %138 = tpu.matmul %105, %137, %cst_53 {dimension_numbers = #tpu.dot_dimension_numbers<[1], [0], [0], [1], [0, 0, 1, 1], [], []>} : vector<16x128xbf16>, vector<128x128xbf16>, vector<16x128xf32> -> vector<16x128xf32>
    %139 = arith.addf %136, %138 : vector<16x128xf32>
    %140 = arith.negf %139 : vector<16x128xf32>
    %141 = math.exp %140 : vector<16x128xf32>
    %cst_54 = arith.constant 1.000000e+00 : f32
    %142 = vector.broadcast %cst_54 : f32 to vector<16x128xf32>
    %143 = arith.addf %142, %141 : vector<16x128xf32>
    %144 = arith.divf %142, %143 : vector<16x128xf32>
    %145 = arith.mulf %114, %124 : vector<16x128xf32>
    %146 = arith.mulf %104, %134 : vector<16x128xf32>
    %147 = arith.addf %145, %146 : vector<16x128xf32>
    %148 = math.tanh %147 : vector<16x128xf32>
    %149 = arith.mulf %148, %144 : vector<16x128xf32>
    %c8_i32_55 = arith.constant 8 : i32
    %150 = arith.muli %arg1, %c8_i32_55 : i32
    %151 = arith.addi %150, %c2_i32 : i32
    %c8_i32_56 = arith.constant 8 : i32
    %152 = arith.cmpi slt, %151, %c8_i32_56 : i32
    %153 = arith.select %152, %149, %103 : vector<16x128xf32>
    %154 = arith.select %152, %147, %104 : vector<16x128xf32>
    %c3_i32 = arith.constant 3 : i32
    %155 = arith.truncf %153 : vector<16x128xf32> to vector<16x128xbf16>
    %156 = arith.index_cast %c3_i32 : i32 to index
    %c0_57 = arith.constant 0 : index
    %c0_58 = arith.constant 0 : index
    %157 = vector.load %arg2[%156, %c0_57, %c0_58] : memref<8x16x512xbf16, #tpu.memory_space<vmem>>, vector<1x16x512xbf16>
    %158 = vector.shape_cast %157 : vector<1x16x512xbf16> to vector<16x512xbf16>
    %159 = vector.extract_strided_slice %158 {offsets = [0, 0], sizes = [16, 128], strides = [1, 1]} : vector<16x512xbf16> to vector<16x128xbf16>
    %160 = arith.extf %159 : vector<16x128xbf16> to vector<16x128xf32>
    %c0_59 = arith.constant 0 : index
    %c0_60 = arith.constant 0 : index
    %161 = vector.load %arg3[%c0_59, %c0_60] : memref<128x512xbf16, #tpu.memory_space<vmem>>, vector<128x128xbf16>
    %cst_61 = arith.constant dense<0.000000e+00> : vector<16x128xf32>
    %162 = tpu.matmul %155, %161, %cst_61 {dimension_numbers = #tpu.dot_dimension_numbers<[1], [0], [0], [1], [0, 0, 1, 1], [], []>} : vector<16x128xbf16>, vector<128x128xbf16>, vector<16x128xf32> -> vector<16x128xf32>
    %163 = arith.addf %160, %162 : vector<16x128xf32>
    %164 = math.tanh %163 : vector<16x128xf32>
    %165 = vector.extract_strided_slice %158 {offsets = [0, 128], sizes = [16, 128], strides = [1, 1]} : vector<16x512xbf16> to vector<16x128xbf16>
    %166 = arith.extf %165 : vector<16x128xbf16> to vector<16x128xf32>
    %c0_62 = arith.constant 0 : index
    %c128_63 = arith.constant 128 : index
    %167 = vector.load %arg3[%c0_62, %c128_63] : memref<128x512xbf16, #tpu.memory_space<vmem>>, vector<128x128xbf16>
    %cst_64 = arith.constant dense<0.000000e+00> : vector<16x128xf32>
    %168 = tpu.matmul %155, %167, %cst_64 {dimension_numbers = #tpu.dot_dimension_numbers<[1], [0], [0], [1], [0, 0, 1, 1], [], []>} : vector<16x128xbf16>, vector<128x128xbf16>, vector<16x128xf32> -> vector<16x128xf32>
    %169 = arith.addf %166, %168 : vector<16x128xf32>
    %170 = arith.negf %169 : vector<16x128xf32>
    %171 = math.exp %170 : vector<16x128xf32>
    %cst_65 = arith.constant 1.000000e+00 : f32
    %172 = vector.broadcast %cst_65 : f32 to vector<16x128xf32>
    %173 = arith.addf %172, %171 : vector<16x128xf32>
    %174 = arith.divf %172, %173 : vector<16x128xf32>
    %175 = vector.extract_strided_slice %158 {offsets = [0, 256], sizes = [16, 128], strides = [1, 1]} : vector<16x512xbf16> to vector<16x128xbf16>
    %176 = arith.extf %175 : vector<16x128xbf16> to vector<16x128xf32>
    %c0_66 = arith.constant 0 : index
    %c256_67 = arith.constant 256 : index
    %177 = vector.load %arg3[%c0_66, %c256_67] : memref<128x512xbf16, #tpu.memory_space<vmem>>, vector<128x128xbf16>
    %cst_68 = arith.constant dense<0.000000e+00> : vector<16x128xf32>
    %178 = tpu.matmul %155, %177, %cst_68 {dimension_numbers = #tpu.dot_dimension_numbers<[1], [0], [0], [1], [0, 0, 1, 1], [], []>} : vector<16x128xbf16>, vector<128x128xbf16>, vector<16x128xf32> -> vector<16x128xf32>
    %179 = arith.addf %176, %178 : vector<16x128xf32>
    %180 = arith.negf %179 : vector<16x128xf32>
    %181 = math.exp %180 : vector<16x128xf32>
    %cst_69 = arith.constant 1.000000e+00 : f32
    %182 = vector.broadcast %cst_69 : f32 to vector<16x128xf32>
    %183 = arith.addf %182, %181 : vector<16x128xf32>
    %184 = arith.divf %182, %183 : vector<16x128xf32>
    %185 = vector.extract_strided_slice %158 {offsets = [0, 384], sizes = [16, 128], strides = [1, 1]} : vector<16x512xbf16> to vector<16x128xbf16>
    %186 = arith.extf %185 : vector<16x128xbf16> to vector<16x128xf32>
    %c0_70 = arith.constant 0 : index
    %c384_71 = arith.constant 384 : index
    %187 = vector.load %arg3[%c0_70, %c384_71] : memref<128x512xbf16, #tpu.memory_space<vmem>>, vector<128x128xbf16>
    %cst_72 = arith.constant dense<0.000000e+00> : vector<16x128xf32>
    %188 = tpu.matmul %155, %187, %cst_72 {dimension_numbers = #tpu.dot_dimension_numbers<[1], [0], [0], [1], [0, 0, 1, 1], [], []>} : vector<16x128xbf16>, vector<128x128xbf16>, vector<16x128xf32> -> vector<16x128xf32>
    %189 = arith.addf %186, %188 : vector<16x128xf32>
    %190 = arith.negf %189 : vector<16x128xf32>
    %191 = math.exp %190 : vector<16x128xf32>
    %cst_73 = arith.constant 1.000000e+00 : f32
    %192 = vector.broadcast %cst_73 : f32 to vector<16x128xf32>
    %193 = arith.addf %192, %191 : vector<16x128xf32>
    %194 = arith.divf %192, %193 : vector<16x128xf32>
    %195 = arith.mulf %164, %174 : vector<16x128xf32>
    %196 = arith.mulf %154, %184 : vector<16x128xf32>
    %197 = arith.addf %195, %196 : vector<16x128xf32>
    %198 = math.tanh %197 : vector<16x128xf32>
    %199 = arith.mulf %198, %194 : vector<16x128xf32>
    %c8_i32_74 = arith.constant 8 : i32
    %200 = arith.muli %arg1, %c8_i32_74 : i32
    %201 = arith.addi %200, %c3_i32 : i32
    %c8_i32_75 = arith.constant 8 : i32
    %202 = arith.cmpi slt, %201, %c8_i32_75 : i32
    %203 = arith.select %202, %199, %153 : vector<16x128xf32>
    %204 = arith.select %202, %197, %154 : vector<16x128xf32>
    %c4_i32 = arith.constant 4 : i32
    %205 = arith.truncf %203 : vector<16x128xf32> to vector<16x128xbf16>
    %206 = arith.index_cast %c4_i32 : i32 to index
    %c0_76 = arith.constant 0 : index
    %c0_77 = arith.constant 0 : index
    %207 = vector.load %arg2[%206, %c0_76, %c0_77] : memref<8x16x512xbf16, #tpu.memory_space<vmem>>, vector<1x16x512xbf16>
    %208 = vector.shape_cast %207 : vector<1x16x512xbf16> to vector<16x512xbf16>
    %209 = vector.extract_strided_slice %208 {offsets = [0, 0], sizes = [16, 128], strides = [1, 1]} : vector<16x512xbf16> to vector<16x128xbf16>
    %210 = arith.extf %209 : vector<16x128xbf16> to vector<16x128xf32>
    %c0_78 = arith.constant 0 : index
    %c0_79 = arith.constant 0 : index
    %211 = vector.load %arg3[%c0_78, %c0_79] : memref<128x512xbf16, #tpu.memory_space<vmem>>, vector<128x128xbf16>
    %cst_80 = arith.constant dense<0.000000e+00> : vector<16x128xf32>
    %212 = tpu.matmul %205, %211, %cst_80 {dimension_numbers = #tpu.dot_dimension_numbers<[1], [0], [0], [1], [0, 0, 1, 1], [], []>} : vector<16x128xbf16>, vector<128x128xbf16>, vector<16x128xf32> -> vector<16x128xf32>
    %213 = arith.addf %210, %212 : vector<16x128xf32>
    %214 = math.tanh %213 : vector<16x128xf32>
    %215 = vector.extract_strided_slice %208 {offsets = [0, 128], sizes = [16, 128], strides = [1, 1]} : vector<16x512xbf16> to vector<16x128xbf16>
    %216 = arith.extf %215 : vector<16x128xbf16> to vector<16x128xf32>
    %c0_81 = arith.constant 0 : index
    %c128_82 = arith.constant 128 : index
    %217 = vector.load %arg3[%c0_81, %c128_82] : memref<128x512xbf16, #tpu.memory_space<vmem>>, vector<128x128xbf16>
    %cst_83 = arith.constant dense<0.000000e+00> : vector<16x128xf32>
    %218 = tpu.matmul %205, %217, %cst_83 {dimension_numbers = #tpu.dot_dimension_numbers<[1], [0], [0], [1], [0, 0, 1, 1], [], []>} : vector<16x128xbf16>, vector<128x128xbf16>, vector<16x128xf32> -> vector<16x128xf32>
    %219 = arith.addf %216, %218 : vector<16x128xf32>
    %220 = arith.negf %219 : vector<16x128xf32>
    %221 = math.exp %220 : vector<16x128xf32>
    %cst_84 = arith.constant 1.000000e+00 : f32
    %222 = vector.broadcast %cst_84 : f32 to vector<16x128xf32>
    %223 = arith.addf %222, %221 : vector<16x128xf32>
    %224 = arith.divf %222, %223 : vector<16x128xf32>
    %225 = vector.extract_strided_slice %208 {offsets = [0, 256], sizes = [16, 128], strides = [1, 1]} : vector<16x512xbf16> to vector<16x128xbf16>
    %226 = arith.extf %225 : vector<16x128xbf16> to vector<16x128xf32>
    %c0_85 = arith.constant 0 : index
    %c256_86 = arith.constant 256 : index
    %227 = vector.load %arg3[%c0_85, %c256_86] : memref<128x512xbf16, #tpu.memory_space<vmem>>, vector<128x128xbf16>
    %cst_87 = arith.constant dense<0.000000e+00> : vector<16x128xf32>
    %228 = tpu.matmul %205, %227, %cst_87 {dimension_numbers = #tpu.dot_dimension_numbers<[1], [0], [0], [1], [0, 0, 1, 1], [], []>} : vector<16x128xbf16>, vector<128x128xbf16>, vector<16x128xf32> -> vector<16x128xf32>
    %229 = arith.addf %226, %228 : vector<16x128xf32>
    %230 = arith.negf %229 : vector<16x128xf32>
    %231 = math.exp %230 : vector<16x128xf32>
    %cst_88 = arith.constant 1.000000e+00 : f32
    %232 = vector.broadcast %cst_88 : f32 to vector<16x128xf32>
    %233 = arith.addf %232, %231 : vector<16x128xf32>
    %234 = arith.divf %232, %233 : vector<16x128xf32>
    %235 = vector.extract_strided_slice %208 {offsets = [0, 384], sizes = [16, 128], strides = [1, 1]} : vector<16x512xbf16> to vector<16x128xbf16>
    %236 = arith.extf %235 : vector<16x128xbf16> to vector<16x128xf32>
    %c0_89 = arith.constant 0 : index
    %c384_90 = arith.constant 384 : index
    %237 = vector.load %arg3[%c0_89, %c384_90] : memref<128x512xbf16, #tpu.memory_space<vmem>>, vector<128x128xbf16>
    %cst_91 = arith.constant dense<0.000000e+00> : vector<16x128xf32>
    %238 = tpu.matmul %205, %237, %cst_91 {dimension_numbers = #tpu.dot_dimension_numbers<[1], [0], [0], [1], [0, 0, 1, 1], [], []>} : vector<16x128xbf16>, vector<128x128xbf16>, vector<16x128xf32> -> vector<16x128xf32>
    %239 = arith.addf %236, %238 : vector<16x128xf32>
    %240 = arith.negf %239 : vector<16x128xf32>
    %241 = math.exp %240 : vector<16x128xf32>
    %cst_92 = arith.constant 1.000000e+00 : f32
    %242 = vector.broadcast %cst_92 : f32 to vector<16x128xf32>
    %243 = arith.addf %242, %241 : vector<16x128xf32>
    %244 = arith.divf %242, %243 : vector<16x128xf32>
    %245 = arith.mulf %214, %224 : vector<16x128xf32>
    %246 = arith.mulf %204, %234 : vector<16x128xf32>
    %247 = arith.addf %245, %246 : vector<16x128xf32>
    %248 = math.tanh %247 : vector<16x128xf32>
    %249 = arith.mulf %248, %244 : vector<16x128xf32>
    %c8_i32_93 = arith.constant 8 : i32
    %250 = arith.muli %arg1, %c8_i32_93 : i32
    %251 = arith.addi %250, %c4_i32 : i32
    %c8_i32_94 = arith.constant 8 : i32
    %252 = arith.cmpi slt, %251, %c8_i32_94 : i32
    %253 = arith.select %252, %249, %203 : vector<16x128xf32>
    %254 = arith.select %252, %247, %204 : vector<16x128xf32>
    %c5_i32 = arith.constant 5 : i32
    %255 = arith.truncf %253 : vector<16x128xf32> to vector<16x128xbf16>
    %256 = arith.index_cast %c5_i32 : i32 to index
    %c0_95 = arith.constant 0 : index
    %c0_96 = arith.constant 0 : index
    %257 = vector.load %arg2[%256, %c0_95, %c0_96] : memref<8x16x512xbf16, #tpu.memory_space<vmem>>, vector<1x16x512xbf16>
    %258 = vector.shape_cast %257 : vector<1x16x512xbf16> to vector<16x512xbf16>
    %259 = vector.extract_strided_slice %258 {offsets = [0, 0], sizes = [16, 128], strides = [1, 1]} : vector<16x512xbf16> to vector<16x128xbf16>
    %260 = arith.extf %259 : vector<16x128xbf16> to vector<16x128xf32>
    %c0_97 = arith.constant 0 : index
    %c0_98 = arith.constant 0 : index
    %261 = vector.load %arg3[%c0_97, %c0_98] : memref<128x512xbf16, #tpu.memory_space<vmem>>, vector<128x128xbf16>
    %cst_99 = arith.constant dense<0.000000e+00> : vector<16x128xf32>
    %262 = tpu.matmul %255, %261, %cst_99 {dimension_numbers = #tpu.dot_dimension_numbers<[1], [0], [0], [1], [0, 0, 1, 1], [], []>} : vector<16x128xbf16>, vector<128x128xbf16>, vector<16x128xf32> -> vector<16x128xf32>
    %263 = arith.addf %260, %262 : vector<16x128xf32>
    %264 = math.tanh %263 : vector<16x128xf32>
    %265 = vector.extract_strided_slice %258 {offsets = [0, 128], sizes = [16, 128], strides = [1, 1]} : vector<16x512xbf16> to vector<16x128xbf16>
    %266 = arith.extf %265 : vector<16x128xbf16> to vector<16x128xf32>
    %c0_100 = arith.constant 0 : index
    %c128_101 = arith.constant 128 : index
    %267 = vector.load %arg3[%c0_100, %c128_101] : memref<128x512xbf16, #tpu.memory_space<vmem>>, vector<128x128xbf16>
    %cst_102 = arith.constant dense<0.000000e+00> : vector<16x128xf32>
    %268 = tpu.matmul %255, %267, %cst_102 {dimension_numbers = #tpu.dot_dimension_numbers<[1], [0], [0], [1], [0, 0, 1, 1], [], []>} : vector<16x128xbf16>, vector<128x128xbf16>, vector<16x128xf32> -> vector<16x128xf32>
    %269 = arith.addf %266, %268 : vector<16x128xf32>
    %270 = arith.negf %269 : vector<16x128xf32>
    %271 = math.exp %270 : vector<16x128xf32>
    %cst_103 = arith.constant 1.000000e+00 : f32
    %272 = vector.broadcast %cst_103 : f32 to vector<16x128xf32>
    %273 = arith.addf %272, %271 : vector<16x128xf32>
    %274 = arith.divf %272, %273 : vector<16x128xf32>
    %275 = vector.extract_strided_slice %258 {offsets = [0, 256], sizes = [16, 128], strides = [1, 1]} : vector<16x512xbf16> to vector<16x128xbf16>
    %276 = arith.extf %275 : vector<16x128xbf16> to vector<16x128xf32>
    %c0_104 = arith.constant 0 : index
    %c256_105 = arith.constant 256 : index
    %277 = vector.load %arg3[%c0_104, %c256_105] : memref<128x512xbf16, #tpu.memory_space<vmem>>, vector<128x128xbf16>
    %cst_106 = arith.constant dense<0.000000e+00> : vector<16x128xf32>
    %278 = tpu.matmul %255, %277, %cst_106 {dimension_numbers = #tpu.dot_dimension_numbers<[1], [0], [0], [1], [0, 0, 1, 1], [], []>} : vector<16x128xbf16>, vector<128x128xbf16>, vector<16x128xf32> -> vector<16x128xf32>
    %279 = arith.addf %276, %278 : vector<16x128xf32>
    %280 = arith.negf %279 : vector<16x128xf32>
    %281 = math.exp %280 : vector<16x128xf32>
    %cst_107 = arith.constant 1.000000e+00 : f32
    %282 = vector.broadcast %cst_107 : f32 to vector<16x128xf32>
    %283 = arith.addf %282, %281 : vector<16x128xf32>
    %284 = arith.divf %282, %283 : vector<16x128xf32>
    %285 = vector.extract_strided_slice %258 {offsets = [0, 384], sizes = [16, 128], strides = [1, 1]} : vector<16x512xbf16> to vector<16x128xbf16>
    %286 = arith.extf %285 : vector<16x128xbf16> to vector<16x128xf32>
    %c0_108 = arith.constant 0 : index
    %c384_109 = arith.constant 384 : index
    %287 = vector.load %arg3[%c0_108, %c384_109] : memref<128x512xbf16, #tpu.memory_space<vmem>>, vector<128x128xbf16>
    %cst_110 = arith.constant dense<0.000000e+00> : vector<16x128xf32>
    %288 = tpu.matmul %255, %287, %cst_110 {dimension_numbers = #tpu.dot_dimension_numbers<[1], [0], [0], [1], [0, 0, 1, 1], [], []>} : vector<16x128xbf16>, vector<128x128xbf16>, vector<16x128xf32> -> vector<16x128xf32>
    %289 = arith.addf %286, %288 : vector<16x128xf32>
    %290 = arith.negf %289 : vector<16x128xf32>
    %291 = math.exp %290 : vector<16x128xf32>
    %cst_111 = arith.constant 1.000000e+00 : f32
    %292 = vector.broadcast %cst_111 : f32 to vector<16x128xf32>
    %293 = arith.addf %292, %291 : vector<16x128xf32>
    %294 = arith.divf %292, %293 : vector<16x128xf32>
    %295 = arith.mulf %264, %274 : vector<16x128xf32>
    %296 = arith.mulf %254, %284 : vector<16x128xf32>
    %297 = arith.addf %295, %296 : vector<16x128xf32>
    %298 = math.tanh %297 : vector<16x128xf32>
    %299 = arith.mulf %298, %294 : vector<16x128xf32>
    %c8_i32_112 = arith.constant 8 : i32
    %300 = arith.muli %arg1, %c8_i32_112 : i32
    %301 = arith.addi %300, %c5_i32 : i32
    %c8_i32_113 = arith.constant 8 : i32
    %302 = arith.cmpi slt, %301, %c8_i32_113 : i32
    %303 = arith.select %302, %299, %253 : vector<16x128xf32>
    %304 = arith.select %302, %297, %254 : vector<16x128xf32>
    %c6_i32 = arith.constant 6 : i32
    %305 = arith.truncf %303 : vector<16x128xf32> to vector<16x128xbf16>
    %306 = arith.index_cast %c6_i32 : i32 to index
    %c0_114 = arith.constant 0 : index
    %c0_115 = arith.constant 0 : index
    %307 = vector.load %arg2[%306, %c0_114, %c0_115] : memref<8x16x512xbf16, #tpu.memory_space<vmem>>, vector<1x16x512xbf16>
    %308 = vector.shape_cast %307 : vector<1x16x512xbf16> to vector<16x512xbf16>
    %309 = vector.extract_strided_slice %308 {offsets = [0, 0], sizes = [16, 128], strides = [1, 1]} : vector<16x512xbf16> to vector<16x128xbf16>
    %310 = arith.extf %309 : vector<16x128xbf16> to vector<16x128xf32>
    %c0_116 = arith.constant 0 : index
    %c0_117 = arith.constant 0 : index
    %311 = vector.load %arg3[%c0_116, %c0_117] : memref<128x512xbf16, #tpu.memory_space<vmem>>, vector<128x128xbf16>
    %cst_118 = arith.constant dense<0.000000e+00> : vector<16x128xf32>
    %312 = tpu.matmul %305, %311, %cst_118 {dimension_numbers = #tpu.dot_dimension_numbers<[1], [0], [0], [1], [0, 0, 1, 1], [], []>} : vector<16x128xbf16>, vector<128x128xbf16>, vector<16x128xf32> -> vector<16x128xf32>
    %313 = arith.addf %310, %312 : vector<16x128xf32>
    %314 = math.tanh %313 : vector<16x128xf32>
    %315 = vector.extract_strided_slice %308 {offsets = [0, 128], sizes = [16, 128], strides = [1, 1]} : vector<16x512xbf16> to vector<16x128xbf16>
    %316 = arith.extf %315 : vector<16x128xbf16> to vector<16x128xf32>
    %c0_119 = arith.constant 0 : index
    %c128_120 = arith.constant 128 : index
    %317 = vector.load %arg3[%c0_119, %c128_120] : memref<128x512xbf16, #tpu.memory_space<vmem>>, vector<128x128xbf16>
    %cst_121 = arith.constant dense<0.000000e+00> : vector<16x128xf32>
    %318 = tpu.matmul %305, %317, %cst_121 {dimension_numbers = #tpu.dot_dimension_numbers<[1], [0], [0], [1], [0, 0, 1, 1], [], []>} : vector<16x128xbf16>, vector<128x128xbf16>, vector<16x128xf32> -> vector<16x128xf32>
    %319 = arith.addf %316, %318 : vector<16x128xf32>
    %320 = arith.negf %319 : vector<16x128xf32>
    %321 = math.exp %320 : vector<16x128xf32>
    %cst_122 = arith.constant 1.000000e+00 : f32
    %322 = vector.broadcast %cst_122 : f32 to vector<16x128xf32>
    %323 = arith.addf %322, %321 : vector<16x128xf32>
    %324 = arith.divf %322, %323 : vector<16x128xf32>
    %325 = vector.extract_strided_slice %308 {offsets = [0, 256], sizes = [16, 128], strides = [1, 1]} : vector<16x512xbf16> to vector<16x128xbf16>
    %326 = arith.extf %325 : vector<16x128xbf16> to vector<16x128xf32>
    %c0_123 = arith.constant 0 : index
    %c256_124 = arith.constant 256 : index
    %327 = vector.load %arg3[%c0_123, %c256_124] : memref<128x512xbf16, #tpu.memory_space<vmem>>, vector<128x128xbf16>
    %cst_125 = arith.constant dense<0.000000e+00> : vector<16x128xf32>
    %328 = tpu.matmul %305, %327, %cst_125 {dimension_numbers = #tpu.dot_dimension_numbers<[1], [0], [0], [1], [0, 0, 1, 1], [], []>} : vector<16x128xbf16>, vector<128x128xbf16>, vector<16x128xf32> -> vector<16x128xf32>
    %329 = arith.addf %326, %328 : vector<16x128xf32>
    %330 = arith.negf %329 : vector<16x128xf32>
    %331 = math.exp %330 : vector<16x128xf32>
    %cst_126 = arith.constant 1.000000e+00 : f32
    %332 = vector.broadcast %cst_126 : f32 to vector<16x128xf32>
    %333 = arith.addf %332, %331 : vector<16x128xf32>
    %334 = arith.divf %332, %333 : vector<16x128xf32>
    %335 = vector.extract_strided_slice %308 {offsets = [0, 384], sizes = [16, 128], strides = [1, 1]} : vector<16x512xbf16> to vector<16x128xbf16>
    %336 = arith.extf %335 : vector<16x128xbf16> to vector<16x128xf32>
    %c0_127 = arith.constant 0 : index
    %c384_128 = arith.constant 384 : index
    %337 = vector.load %arg3[%c0_127, %c384_128] : memref<128x512xbf16, #tpu.memory_space<vmem>>, vector<128x128xbf16>
    %cst_129 = arith.constant dense<0.000000e+00> : vector<16x128xf32>
    %338 = tpu.matmul %305, %337, %cst_129 {dimension_numbers = #tpu.dot_dimension_numbers<[1], [0], [0], [1], [0, 0, 1, 1], [], []>} : vector<16x128xbf16>, vector<128x128xbf16>, vector<16x128xf32> -> vector<16x128xf32>
    %339 = arith.addf %336, %338 : vector<16x128xf32>
    %340 = arith.negf %339 : vector<16x128xf32>
    %341 = math.exp %340 : vector<16x128xf32>
    %cst_130 = arith.constant 1.000000e+00 : f32
    %342 = vector.broadcast %cst_130 : f32 to vector<16x128xf32>
    %343 = arith.addf %342, %341 : vector<16x128xf32>
    %344 = arith.divf %342, %343 : vector<16x128xf32>
    %345 = arith.mulf %314, %324 : vector<16x128xf32>
    %346 = arith.mulf %304, %334 : vector<16x128xf32>
    %347 = arith.addf %345, %346 : vector<16x128xf32>
    %348 = math.tanh %347 : vector<16x128xf32>
    %349 = arith.mulf %348, %344 : vector<16x128xf32>
    %c8_i32_131 = arith.constant 8 : i32
    %350 = arith.muli %arg1, %c8_i32_131 : i32
    %351 = arith.addi %350, %c6_i32 : i32
    %c8_i32_132 = arith.constant 8 : i32
    %352 = arith.cmpi slt, %351, %c8_i32_132 : i32
    %353 = arith.select %352, %349, %303 : vector<16x128xf32>
    %354 = arith.select %352, %347, %304 : vector<16x128xf32>
    %c7_i32 = arith.constant 7 : i32
    %355 = arith.truncf %353 : vector<16x128xf32> to vector<16x128xbf16>
    %356 = arith.index_cast %c7_i32 : i32 to index
    %c0_133 = arith.constant 0 : index
    %c0_134 = arith.constant 0 : index
    %357 = vector.load %arg2[%356, %c0_133, %c0_134] : memref<8x16x512xbf16, #tpu.memory_space<vmem>>, vector<1x16x512xbf16>
    %358 = vector.shape_cast %357 : vector<1x16x512xbf16> to vector<16x512xbf16>
    %359 = vector.extract_strided_slice %358 {offsets = [0, 0], sizes = [16, 128], strides = [1, 1]} : vector<16x512xbf16> to vector<16x128xbf16>
    %360 = arith.extf %359 : vector<16x128xbf16> to vector<16x128xf32>
    %c0_135 = arith.constant 0 : index
    %c0_136 = arith.constant 0 : index
    %361 = vector.load %arg3[%c0_135, %c0_136] : memref<128x512xbf16, #tpu.memory_space<vmem>>, vector<128x128xbf16>
    %cst_137 = arith.constant dense<0.000000e+00> : vector<16x128xf32>
    %362 = tpu.matmul %355, %361, %cst_137 {dimension_numbers = #tpu.dot_dimension_numbers<[1], [0], [0], [1], [0, 0, 1, 1], [], []>} : vector<16x128xbf16>, vector<128x128xbf16>, vector<16x128xf32> -> vector<16x128xf32>
    %363 = arith.addf %360, %362 : vector<16x128xf32>
    %364 = math.tanh %363 : vector<16x128xf32>
    %365 = vector.extract_strided_slice %358 {offsets = [0, 128], sizes = [16, 128], strides = [1, 1]} : vector<16x512xbf16> to vector<16x128xbf16>
    %366 = arith.extf %365 : vector<16x128xbf16> to vector<16x128xf32>
    %c0_138 = arith.constant 0 : index
    %c128_139 = arith.constant 128 : index
    %367 = vector.load %arg3[%c0_138, %c128_139] : memref<128x512xbf16, #tpu.memory_space<vmem>>, vector<128x128xbf16>
    %cst_140 = arith.constant dense<0.000000e+00> : vector<16x128xf32>
    %368 = tpu.matmul %355, %367, %cst_140 {dimension_numbers = #tpu.dot_dimension_numbers<[1], [0], [0], [1], [0, 0, 1, 1], [], []>} : vector<16x128xbf16>, vector<128x128xbf16>, vector<16x128xf32> -> vector<16x128xf32>
    %369 = arith.addf %366, %368 : vector<16x128xf32>
    %370 = arith.negf %369 : vector<16x128xf32>
    %371 = math.exp %370 : vector<16x128xf32>
    %cst_141 = arith.constant 1.000000e+00 : f32
    %372 = vector.broadcast %cst_141 : f32 to vector<16x128xf32>
    %373 = arith.addf %372, %371 : vector<16x128xf32>
    %374 = arith.divf %372, %373 : vector<16x128xf32>
    %375 = vector.extract_strided_slice %358 {offsets = [0, 256], sizes = [16, 128], strides = [1, 1]} : vector<16x512xbf16> to vector<16x128xbf16>
    %376 = arith.extf %375 : vector<16x128xbf16> to vector<16x128xf32>
    %c0_142 = arith.constant 0 : index
    %c256_143 = arith.constant 256 : index
    %377 = vector.load %arg3[%c0_142, %c256_143] : memref<128x512xbf16, #tpu.memory_space<vmem>>, vector<128x128xbf16>
    %cst_144 = arith.constant dense<0.000000e+00> : vector<16x128xf32>
    %378 = tpu.matmul %355, %377, %cst_144 {dimension_numbers = #tpu.dot_dimension_numbers<[1], [0], [0], [1], [0, 0, 1, 1], [], []>} : vector<16x128xbf16>, vector<128x128xbf16>, vector<16x128xf32> -> vector<16x128xf32>
    %379 = arith.addf %376, %378 : vector<16x128xf32>
    %380 = arith.negf %379 : vector<16x128xf32>
    %381 = math.exp %380 : vector<16x128xf32>
    %cst_145 = arith.constant 1.000000e+00 : f32
    %382 = vector.broadcast %cst_145 : f32 to vector<16x128xf32>
    %383 = arith.addf %382, %381 : vector<16x128xf32>
    %384 = arith.divf %382, %383 : vector<16x128xf32>
    %385 = vector.extract_strided_slice %358 {offsets = [0, 384], sizes = [16, 128], strides = [1, 1]} : vector<16x512xbf16> to vector<16x128xbf16>
    %386 = arith.extf %385 : vector<16x128xbf16> to vector<16x128xf32>
    %c0_146 = arith.constant 0 : index
    %c384_147 = arith.constant 384 : index
    %387 = vector.load %arg3[%c0_146, %c384_147] : memref<128x512xbf16, #tpu.memory_space<vmem>>, vector<128x128xbf16>
    %cst_148 = arith.constant dense<0.000000e+00> : vector<16x128xf32>
    %388 = tpu.matmul %355, %387, %cst_148 {dimension_numbers = #tpu.dot_dimension_numbers<[1], [0], [0], [1], [0, 0, 1, 1], [], []>} : vector<16x128xbf16>, vector<128x128xbf16>, vector<16x128xf32> -> vector<16x128xf32>
    %389 = arith.addf %386, %388 : vector<16x128xf32>
    %390 = arith.negf %389 : vector<16x128xf32>
    %391 = math.exp %390 : vector<16x128xf32>
    %cst_149 = arith.constant 1.000000e+00 : f32
    %392 = vector.broadcast %cst_149 : f32 to vector<16x128xf32>
    %393 = arith.addf %392, %391 : vector<16x128xf32>
    %394 = arith.divf %392, %393 : vector<16x128xf32>
    %395 = arith.mulf %364, %374 : vector<16x128xf32>
    %396 = arith.mulf %354, %384 : vector<16x128xf32>
    %397 = arith.addf %395, %396 : vector<16x128xf32>
    %398 = math.tanh %397 : vector<16x128xf32>
    %399 = arith.mulf %398, %394 : vector<16x128xf32>
    %c8_i32_150 = arith.constant 8 : i32
    %400 = arith.muli %arg1, %c8_i32_150 : i32
    %401 = arith.addi %400, %c7_i32 : i32
    %c8_i32_151 = arith.constant 8 : i32
    %402 = arith.cmpi slt, %401, %c8_i32_151 : i32
    %403 = arith.select %402, %399, %353 : vector<16x128xf32>
    %404 = arith.select %402, %397, %354 : vector<16x128xf32>
    %c8_i32_152 = arith.constant 8 : i32
    %c0_153 = arith.constant 0 : index
    %c0_154 = arith.constant 0 : index
    %405 = vector.load %arg5[%c0_153, %c0_154] : memref<16x128xf32, #tpu.memory_space<vmem>>, vector<16x128xf32>
    tpu.vector_store %arg5[%c0_153, %c0_154], %403 {strides = array<i32>} : memref<16x128xf32, #tpu.memory_space<vmem>>, vector<16x128xf32>,
    %c0_155 = arith.constant 0 : index
    %c0_156 = arith.constant 0 : index
    %406 = vector.load %arg6[%c0_155, %c0_156] : memref<16x128xf32, #tpu.memory_space<vmem>>, vector<16x128xf32>
    tpu.vector_store %arg6[%c0_155, %c0_156], %404 {strides = array<i32>} : memref<16x128xf32, #tpu.memory_space<vmem>>, vector<16x128xf32>,
    %c0_i32_157 = arith.constant 0 : i32
    %407 = arith.cmpi eq, %arg1, %c0_i32_157 : i32
    %408 = arith.extui %407 : i1 to i32
    %c0_i32_158 = arith.constant 0 : i32
    %409 = arith.cmpi ne, %408, %c0_i32_158 : i32
    scf.if %409 {
      %c0_159 = arith.constant 0 : index
      %c0_160 = arith.constant 0 : index
      %410 = vector.load %arg4[%c0_159, %c0_160] : memref<16x128xf32, #tpu.memory_space<vmem>>, vector<16x128xf32>
      tpu.vector_store %arg4[%c0_159, %c0_160], %403 {strides = array<i32>} : memref<16x128xf32, #tpu.memory_space<vmem>>, vector<16x128xf32>,
    } else {
    }
    return
  }
  func.func @transform_0(%arg0: i32, %arg1: i32) -> (i32, i32, i32) {
    %c0_i32 = arith.constant 0 : i32
    %c0_i32_0 = arith.constant 0 : i32
    return %arg1, %arg0, %c0_i32 : i32, i32, i32
  }
  func.func @transform_1(%arg0: i32, %arg1: i32) -> (i32, i32) {
    %c0_i32 = arith.constant 0 : i32
    %c0_i32_0 = arith.constant 0 : i32
    %c0_i32_1 = arith.constant 0 : i32
    return %c0_i32, %c0_i32_0 : i32, i32
  }
  func.func @transform_2(%arg0: i32, %arg1: i32) -> (i32, i32) {
    %c0_i32 = arith.constant 0 : i32
    %c0_i32_0 = arith.constant 0 : i32
    return %arg0, %c0_i32 : i32, i32
  }
}

</mosaic_0001>

<bundles_post_ra>
// kernel: tpu_custom_call.1
= control target key start
LH: loop header
LB: loop body
LE: loop exit
PB: predicated region body
PF: predicated region fallthrough
CT: control target
= control target key end

     0   :  { %7 = vsyncpa [#allocation5], 0  ;;  %s4573_s0 = inlined_call_operand.hbm [shape: bf16[8,16,512], index: 0, kind: input, shape index: {}]   ;;  %s4574_s1 = inlined_call_operand.hbm [shape: bf16[128,512], index: 1, kind: input, shape index: {}]   ;;  %s4575_s2 = inlined_call_operand.hbm [shape: f32[16,128], index: 2, kind: output, shape index: {}]  }
   0x1   :  { %8 = vsyncpa [#allocation8], 0 }
   0x2   :  { %9 = vsyncpa [#allocation6], 0  ;;  %s3783_s9 = smov [#allocation4]  }
   0x3   :  { %s15_s10 = sshll.u32 %s3783_s9, 4  ;;  %s16_s10 = int_to_ptr.vmem [resolvable:$true] %s15_s10 }
   0x4   :  { %s3725_s11 = scalar_lea.vmem %s16_s10, 4096  ;;  %p3730_p1 = scmp.lt.s32.totalorder %s16_s10, %s16_s10 }
   0x5   :  { %p3726_p0 = scmp.ne.s32.totalorder %s16_s10, %s3725_s11  ;;  %p3731_p2 = scmp.lt.s32.totalorder %s3725_s11, %s3725_s11 }
   0x7   :  { %p3732_p3 = por %p3731_p2, %p3730_p1 }
   0x9   :  { %p3733_p4 = pnand %p3732_p3, %p3726_p0 }
   0xb   :  { %3736 = shalt.err (!%p3733_p4)
}
   0xc   :  { %s3784_s12 = smov 256   ;;  %s3785_s13 = smov 16  }
   0xd   :  { %21 = dma.hbm_to_vmem [thread:$0]  %s4573_s0, 4096, %s16_s10, [#allocation5], %s3784_s12, %s3784_s12, %s3785_s13  }
   0xe   :  { %s3786_s16 = smov [#allocation7]  }
   0xf   :  { %s27_s17 = sshll.u32 %s3786_s16, 4  ;;  %s28_s17 = int_to_ptr.vmem [resolvable:$true] %s27_s17 }
  0x10   :  { %s3745_s18 = scalar_lea.vmem %s28_s17, 4096  ;;  %p3750_p6 = scmp.lt.s32.totalorder %s28_s17, %s28_s17 }
  0x11   :  { %p3746_p5 = scmp.ne.s32.totalorder %s28_s17, %s3745_s18  ;;  %p3751_p7 = scmp.lt.s32.totalorder %s3745_s18, %s3745_s18 }
  0x13   :  { %p3752_p8 = por %p3751_p7, %p3750_p6 }
  0x15   :  { %p3753_p9 = pnand %p3752_p8, %p3746_p5 }
  0x17   :  { %3756 = shalt.err (!%p3753_p9)
}
  0x18   :  { %33 = dma.hbm_to_vmem [thread:$0]  %s4574_s1, 4096, %s28_s17, [#allocation8], %s3784_s12, %s3784_s12, %s3785_s13  }
  0x19   :  { %3777 = dma.done.wait [#allocation5], 4096  }
  0x1a   :  { %3778 = vsyncadd [#allocation5], 4294963200 }
  0x1b   :  { %3779 = dma.done.wait [#allocation8], 4096  }
  0x1c   :  { %3780 = vsyncadd [#allocation8], 4294963200  ;;  %v3787_v0 = vmov 0.0   ;;  %vm3788_vm0 = vmmov 0   ;;  %v3820_v1 = vld [vmem:[#allocation7 + $0xe0] ss:$16 sps:$4 sm:$0xff]  }
  0x1d   :  { %2743 = vmatprep.subr.bf16.mxu0 %v3787_v0  ;;  %2763 = vmatprep.subr.bf16.mxu1 %v3787_v0  ;;  %v3822_v2 = vld [vmem:[#allocation7 + $0xe4] ss:$16 sps:$4 sm:$0xff]   ;;  %v3825_v3 = vld [vmem:[#allocation7 + $0xc0] ss:$16 sps:$4 sm:$0xff]   ;;  %v3881_v17 = vld [vmem:[#allocation7 + $0xe8] ss:$16 sps:$4 sm:$0xff]  }
  0x1e   :  { %2759 = vmatprep.mubr.msk.bf16.mxu0 %vm3788_vm0, %v3787_v0  ;;  %2779 = vmatprep.mubr.msk.bf16.mxu1 %vm3788_vm0, %v3787_v0  ;;  %v3829_v4 = vld [vmem:[#allocation7 + $0xc4] ss:$16 sps:$4 sm:$0xff]   ;;  %v3833_v5 = vld [vmem:[#allocation7 + $0xa0] ss:$16 sps:$4 sm:$0xff]   ;;  %v3885_v18 = vld [vmem:[#allocation7 + $0xec] ss:$16 sps:$4 sm:$0xff]  }
  0x1f   :  { %2744 = vmatpush3.bf16.msra.mxu0 %v3820_v1  ;;  %2764 = vmatpush3.bf16.msra.mxu1 %v3822_v2  ;;  %v3837_v6 = vld [vmem:[#allocation7 + $0xa4] ss:$16 sps:$4 sm:$0xff]   ;;  %v3841_v7 = vld [vmem:[#allocation7 + $0x80] ss:$16 sps:$4 sm:$0xff]   ;;  %v3789_v19 = vmov 0.0|0.0   ;;  %v55_v49 = vld [vmem:[#allocation4 + $0x8] sm:$0xff] }
  0x20   :  { %2745 = vmatprep.subr.bf16.mxu0 %v3787_v0  ;;  %2765 = vmatprep.subr.bf16.mxu1 %v3787_v0  ;;  %v3845_v8 = vld [vmem:[#allocation7 + $0x84] ss:$16 sps:$4 sm:$0xff]   ;;  %v3849_v9 = vld [vmem:[#allocation7 + $0x60] ss:$16 sps:$4 sm:$0xff]   ;;  %v3889_v20 = vld [vmem:[#allocation7 + $0xc8] ss:$16 sps:$4 sm:$0xff]   ;;  %v296_v52 = vunpack.c.l.bf16 %v55_v49 }
  0x21   :  { %v3853_v10 = vld [vmem:[#allocation7 + $0x64] ss:$16 sps:$4 sm:$0xff]   ;;  %v3857_v11 = vld [vmem:[#allocation7 + $0x40] ss:$16 sps:$4 sm:$0xff]   ;;  %v3893_v21 = vld [vmem:[#allocation7 + $0xcc] ss:$16 sps:$4 sm:$0xff]  }
  0x22   :  { %v3861_v12 = vld [vmem:[#allocation7 + $0x44] ss:$16 sps:$4 sm:$0xff]   ;;  %v3865_v13 = vld [vmem:[#allocation7 + $0x20] ss:$16 sps:$4 sm:$0xff]   ;;  %v3901_v22 = vld [vmem:[#allocation7 + $0xa8] ss:$16 sps:$4 sm:$0xff]  }
  0x23   :  { %2746 = vmatpush3.bf16.msra.mxu0 %v3825_v3  ;;  %2766 = vmatpush3.bf16.msra.mxu1 %v3829_v4  ;;  %v3869_v14 = vld [vmem:[#allocation7 + $0x24] ss:$16 sps:$4 sm:$0xff]   ;;  %v3873_v15 = vld [vmem:[#allocation7] ss:$16 sps:$4 sm:$0xff]   ;;  %v3905_v23 = vld [vmem:[#allocation7 + $0xac] ss:$16 sps:$4 sm:$0xff]  }
  0x24   :  { %2747 = vmatprep.subr.bf16.mxu0 %v3787_v0  ;;  %2767 = vmatprep.subr.bf16.mxu1 %v3787_v0  ;;  %v3877_v16 = vld [vmem:[#allocation7 + $0x4] ss:$16 sps:$4 sm:$0xff]   ;;  %v3909_v24 = vld [vmem:[#allocation7 + $0x88] ss:$16 sps:$4 sm:$0xff]   ;;  %v3913_v25 = vld [vmem:[#allocation7 + $0x8c] ss:$16 sps:$4 sm:$0xff]  }
  0x25   :  { %v3917_v26 = vld [vmem:[#allocation7 + $0x68] ss:$16 sps:$4 sm:$0xff]   ;;  %v3921_v27 = vld [vmem:[#allocation7 + $0x6c] ss:$16 sps:$4 sm:$0xff]   ;;  %v54_v42 = vld [vmem:[#allocation4] sm:$0xff]  ;;  %v419_v63 = vrot.slane %v55_v49, 4 }
  0x26   :  { %v3925_v28 = vld [vmem:[#allocation7 + $0x48] ss:$16 sps:$4 sm:$0xff]   ;;  %v3929_v29 = vld [vmem:[#allocation7 + $0x4c] ss:$16 sps:$4 sm:$0xff]   ;;  %v171_v43 = vrot.slane %v54_v42, 4  ;;  %v56_v44 = vld [vmem:[#allocation4 + $0x10] sm:$0xff] }
  0x27   :  { %2748 = vmatpush3.bf16.msra.mxu0 %v3833_v5  ;;  %2768 = vmatpush3.bf16.msra.mxu1 %v3837_v6  ;;  %v3933_v30 = vld [vmem:[#allocation7 + $0x28] ss:$16 sps:$4 sm:$0xff]   ;;  %v3937_v31 = vld [vmem:[#allocation7 + $0x2c] ss:$16 sps:$4 sm:$0xff]   ;;  %v172_v46 = vrot.slane %v56_v44, 4  ;;  %s3790_s0 = smov [#allocation9]  }
  0x28   :  { %2749 = vmatprep.subr.bf16.mxu0 %v3787_v0  ;;  %2769 = vmatprep.subr.bf16.mxu1 %v3787_v0  ;;  %v3941_v32 = vld [vmem:[#allocation7 + $0x8] ss:$16 sps:$4 sm:$0xff]   ;;  %v3945_v33 = vld [vmem:[#allocation7 + $0xc] ss:$16 sps:$4 sm:$0xff]   ;;  %v175_v45 = vunpack.c.l.bf16 %v171_v43  ;;  %v58_v43 = vunpack.c.l.bf16 %v54_v42  ;;  %s2362_s1 = sshll.u32 %s3790_s0, 4  ;;  %s2363_s1 = int_to_ptr.vmem [resolvable:$true] %s2362_s1 }
  0x29   :  { %v176_v48 = vunpack.c.l.bf16 %v172_v46  ;;  %v57_v53 = vld [vmem:[#allocation4 + $0x18] sm:$0xff]  ;;  %s3757_s21 = scalar_lea.vmem %s2363_s1, 256  ;;  %p3762_p11 = scmp.lt.s32.totalorder %s2363_s1, %s2363_s1 }
  0x2a   :  { %v297_v57 = vunpack.c.l.bf16 %v57_v53  ;;  %p3758_p10 = scmp.ne.s32.totalorder %s2363_s1, %s3757_s21  ;;  %p3763_p12 = scmp.lt.s32.totalorder %s3757_s21, %s3757_s21 }
  0x2b   :  { %2750 = vmatpush3.bf16.msra.mxu0 %v3841_v7  ;;  %2770 = vmatpush3.bf16.msra.mxu1 %v3845_v8 }
  0x2c   :  { %2751 = vmatprep.subr.bf16.mxu0 %v3787_v0  ;;  %2771 = vmatprep.subr.bf16.mxu1 %v3787_v0  ;;  %p3764_p13 = por %p3763_p12, %p3762_p11 }
  0x2e   :  { %p3765_p0 = pnand %p3764_p13, %p3758_p10 }
  0x2f   :  { %2752 = vmatpush3.bf16.msra.mxu0 %v3849_v9  ;;  %2772 = vmatpush3.bf16.msra.mxu1 %v3853_v10 }
  0x30   :  { %2753 = vmatprep.subr.bf16.mxu0 %v3787_v0  ;;  %2773 = vmatprep.subr.bf16.mxu1 %v3787_v0 }
  0x33   :  { %2754 = vmatpush3.bf16.msra.mxu0 %v3857_v11  ;;  %2774 = vmatpush3.bf16.msra.mxu1 %v3861_v12 }
  0x34   :  { %2755 = vmatprep.subr.bf16.mxu0 %v3787_v0  ;;  %2775 = vmatprep.subr.bf16.mxu1 %v3787_v0 }
  0x37   :  { %2756 = vmatpush3.bf16.msra.mxu0 %v3865_v13  ;;  %2776 = vmatpush3.bf16.msra.mxu1 %v3869_v14 }
  0x38   :  { %2757 = vmatprep.subr.bf16.mxu0 %v3787_v0  ;;  %2777 = vmatprep.subr.bf16.mxu1 %v3787_v0 }
  0x3b   :  { %2758 = vmatpush3.bf16.msra.mxu0 %v3873_v15  ;;  %2778 = vmatpush3.bf16.msra.mxu1 %v3877_v16 }
  0x3c   :  { %2783 = vmatprep.subr.bf16.mxu0 %v3787_v0  ;;  %2803 = vmatprep.subr.bf16.mxu1 %v3787_v0 }
  0x3e   :  { %2760 = vmatmul.mubr.bf16.vlgmr.msra.gmra.mxu0 %v3789_v19  ;;  %2780 = vmatmul.mubr.bf16.vlgmr.msra.gmra.mxu1 %v3789_v19 }
  0x3f   :  { %2784 = vmatpush3.bf16.msra.mxu0 %v3881_v17  ;;  %2804 = vmatpush3.bf16.msra.mxu1 %v3885_v18 }
  0x40   :  { %2785 = vmatprep.subr.bf16.mxu0 %v3787_v0  ;;  %2805 = vmatprep.subr.bf16.mxu1 %v3787_v0 }
  0x41   :  { %2799 = vmatprep.mubr.msk.bf16.mxu0 %vm3788_vm0, %v3787_v0  ;;  %2819 = vmatprep.mubr.msk.bf16.mxu1 %vm3788_vm0, %v3787_v0 }
  0x43   :  { %2786 = vmatpush3.bf16.msra.mxu0 %v3889_v20  ;;  %2806 = vmatpush3.bf16.msra.mxu1 %v3893_v21 }
  0x44   :  { %2787 = vmatprep.subr.bf16.mxu0 %v3787_v0  ;;  %2807 = vmatprep.subr.bf16.mxu1 %v3787_v0 }
  0x47   :  { %2788 = vmatpush3.bf16.msra.mxu0 %v3901_v22  ;;  %2808 = vmatpush3.bf16.msra.mxu1 %v3905_v23 }
  0x48   :  { %2789 = vmatprep.subr.bf16.mxu0 %v3787_v0  ;;  %2809 = vmatprep.subr.bf16.mxu1 %v3787_v0 }
  0x4b   :  { %2790 = vmatpush3.bf16.msra.mxu0 %v3909_v24  ;;  %2810 = vmatpush3.bf16.msra.mxu1 %v3913_v25 }
  0x4c   :  { %2791 = vmatprep.subr.bf16.mxu0 %v3787_v0  ;;  %2811 = vmatprep.subr.bf16.mxu1 %v3787_v0 }
  0x4f   :  { %2792 = vmatpush3.bf16.msra.mxu0 %v3917_v26  ;;  %2812 = vmatpush3.bf16.msra.mxu1 %v3921_v27 }
  0x50   :  { %2793 = vmatprep.subr.bf16.mxu0 %v3787_v0  ;;  %2813 = vmatprep.subr.bf16.mxu1 %v3787_v0 }
  0x53   :  { %2794 = vmatpush3.bf16.msra.mxu0 %v3925_v28  ;;  %2814 = vmatpush3.bf16.msra.mxu1 %v3929_v29 }
  0x54   :  { %2795 = vmatprep.subr.bf16.mxu0 %v3787_v0  ;;  %2815 = vmatprep.subr.bf16.mxu1 %v3787_v0 }
  0x57   :  { %2796 = vmatpush3.bf16.msra.mxu0 %v3933_v30  ;;  %2816 = vmatpush3.bf16.msra.mxu1 %v3937_v31 }
  0x58   :  { %2797 = vmatprep.subr.bf16.mxu0 %v3787_v0  ;;  %2817 = vmatprep.subr.bf16.mxu1 %v3787_v0 }
  0x5b   :  { %2798 = vmatpush3.bf16.msra.mxu0 %v3941_v32  ;;  %2818 = vmatpush3.bf16.msra.mxu1 %v3945_v33 }
  0x5c   :  { %2823 = vmatprep.subr.bf16.mxu0 %v3787_v0  ;;  %2843 = vmatprep.subr.bf16.mxu1 %v3787_v0 }
  0x5e   :  { %2800 = vmatmul.mubr.bf16.vlgmr.msra.gmra.mxu0 %v3789_v19  ;;  %2820 = vmatmul.mubr.bf16.vlgmr.msra.gmra.mxu1 %v3789_v19 }
  0x5f   :  { %2824 = vmatpush3.bf16.msra.mxu0 %v3820_v1  ;;  %2844 = vmatpush3.bf16.msra.mxu1 %v3822_v2 }
  0x60   :  { %2825 = vmatprep.subr.bf16.mxu0 %v3787_v0  ;;  %2845 = vmatprep.subr.bf16.mxu1 %v3787_v0 }
  0x61   :  { %2839 = vmatprep.mubr.msk.bf16.mxu0 %vm3788_vm0, %v3787_v0  ;;  %2859 = vmatprep.mubr.msk.bf16.mxu1 %vm3788_vm0, %v3787_v0 }
  0x63   :  { %2826 = vmatpush3.bf16.msra.mxu0 %v3825_v3  ;;  %2846 = vmatpush3.bf16.msra.mxu1 %v3829_v4 }
  0x64   :  { %2827 = vmatprep.subr.bf16.mxu0 %v3787_v0  ;;  %2847 = vmatprep.subr.bf16.mxu1 %v3787_v0 }
  0x67   :  { %2828 = vmatpush3.bf16.msra.mxu0 %v3833_v5  ;;  %2848 = vmatpush3.bf16.msra.mxu1 %v3837_v6 }
  0x68   :  { %2829 = vmatprep.subr.bf16.mxu0 %v3787_v0  ;;  %2849 = vmatprep.subr.bf16.mxu1 %v3787_v0 }
  0x6b   :  { %2830 = vmatpush3.bf16.msra.mxu0 %v3841_v7  ;;  %2850 = vmatpush3.bf16.msra.mxu1 %v3845_v8 }
  0x6c   :  { %2831 = vmatprep.subr.bf16.mxu0 %v3787_v0  ;;  %2851 = vmatprep.subr.bf16.mxu1 %v3787_v0 }
  0x6f   :  { %2832 = vmatpush3.bf16.msra.mxu0 %v3849_v9  ;;  %2852 = vmatpush3.bf16.msra.mxu1 %v3853_v10 }
  0x70   :  { %2833 = vmatprep.subr.bf16.mxu0 %v3787_v0  ;;  %2853 = vmatprep.subr.bf16.mxu1 %v3787_v0 }
  0x73   :  { %2834 = vmatpush3.bf16.msra.mxu0 %v3857_v11  ;;  %2854 = vmatpush3.bf16.msra.mxu1 %v3861_v12 }
  0x74   :  { %2835 = vmatprep.subr.bf16.mxu0 %v3787_v0  ;;  %2855 = vmatprep.subr.bf16.mxu1 %v3787_v0 }
  0x77   :  { %2836 = vmatpush3.bf16.msra.mxu0 %v3865_v13  ;;  %2856 = vmatpush3.bf16.msra.mxu1 %v3869_v14 }
  0x78   :  { %2837 = vmatprep.subr.bf16.mxu0 %v3787_v0  ;;  %2857 = vmatprep.subr.bf16.mxu1 %v3787_v0 }
  0x7b   :  { %2838 = vmatpush3.bf16.msra.mxu0 %v3873_v15  ;;  %2858 = vmatpush3.bf16.msra.mxu1 %v3877_v16 }
  0x7c   :  { %2863 = vmatprep.subr.bf16.mxu0 %v3787_v0  ;;  %2883 = vmatprep.subr.bf16.mxu1 %v3787_v0 }
  0xfe   :  { %v158_v34 = vpop.f32.mrf.mxu0  ;;  %v275_v35 = vpop.f32.mrf.mxu1 }
  0xff   :  { %v282_v47 = vadd.f32 %v275_v35, %v175_v45 }
 0x100   :  { %v2761_v36 = vpop.f32.mrf.mxu0  ;;  %v2781_v37 = vpop.f32.mrf.mxu1 }
 0x101   :  { %v2391_v50 = vmul.f32 -1.442695, %v282_v47  ;;  %v420_v37 = vrot.slane %v57_v53, 4 }
 0x102   :  { %v161_v38 = vpop.f32.mrf.mxu0  ;;  %v278_v39 = vpop.f32.mrf.mxu1 }
 0x103   :  { %v283_v51 = vadd.f32 %v278_v39, %v176_v48  ;;  %3425 = vpow2.f32 %v2391_v50  ;;  %v424_v45 = vunpack.c.l.bf16 %v420_v37  ;;  %v165_v48 = vadd.f32 %v158_v34, %v58_v43 }
 0x104   :  { %v2762_v40 = vpop.f32.mrf.mxu0  ;;  %v2782_v41 = vpop.f32.mrf.mxu1 }
 0x105   :  { %v2392_v54 = vmul.f32 -1.442695, %v283_v51  ;;  %v423_v41 = vunpack.c.l.bf16 %v419_v63 }
 0x107   :  { %3427 = vpow2.f32 %v2392_v54  ;;  %v59_v54 = vunpack.c.l.bf16 %v56_v44 }
 0x110   :  { %v3426_v46 = vpop.eup %3425 }
 0x111   :  { %v290_v51 = vadd.f32 1.0, %v3426_v46 }
 0x11e   :  { %v396_v55 = vpop.f32.mrf.mxu0  ;;  %v523_v58 = vpop.f32.mrf.mxu1 }
 0x11f   :  { %v403_v56 = vadd.f32 %v396_v55, %v296_v52  ;;  %v530_v47 = vadd.f32 %v523_v58, %v423_v41  ;;  %v3428_v52 = vpop.eup %3427 }
 0x120   :  { %v2801_v59 = vpop.f32.mrf.mxu0  ;;  %v2821_v61 = vpop.f32.mrf.mxu1 }
 0x121   :  { %v2401_v60 = vmul.f32 -1.442695, %v403_v56  ;;  %v2411_v55 = vmul.f32 -1.442695, %v530_v47  ;;  %v166_v59 = vadd.f32 %v161_v38, %v59_v54 }
 0x122   :  { %v399_v62 = vpop.f32.mrf.mxu0  ;;  %v526_v35 = vpop.f32.mrf.mxu1 }
 0x123   :  { %3429 = vpow2.f32 %v2401_v60  ;;  %v404_v19 = vadd.f32 %v399_v62, %v297_v57  ;;  %v531_v50 = vadd.f32 %v526_v35, %v424_v45  ;;  %v291_v57 = vadd.f32 1.0, %v3428_v52 }
 0x124   :  { %v2802_v36 = vpop.f32.mrf.mxu0  ;;  %v2822_v40 = vpop.f32.mrf.mxu1 }
 0x125   :  { %v2402_v39 = vmul.f32 -1.442695, %v404_v19  ;;  %v2412_v56 = vmul.f32 -1.442695, %v531_v50 }
 0x127   :  { %3431 = vpow2.f32 %v2402_v39 }
 0x128   :  { %3433 = vtanh.f32 %v165_v48 }
 0x129   :  { %3435 = vrcp.f32 %v290_v51 }
 0x12a   :  { %3437 = vpow2.f32 %v2411_v55 }
 0x130   :  { %v3430_v49 = vpop.eup %3429 }
 0x131   :  { %v411_v53 = vadd.f32 1.0, %v3430_v49 }
 0x133   :  { %3439 = vrcp.f32 %v411_v53 }
 0x134   :  { %v3432_v60 = vpop.eup %3431  ;;  %3441 = vpow2.f32 %v2412_v56 }
 0x135   :  { %3443 = vrcp.f32 %v291_v57  ;;  %v412_v42 = vadd.f32 1.0, %v3432_v60  ;;  %v3434_v34 = vpop.eup %3433 }
 0x136   :  { %3445 = vtanh.f32 %v166_v59  ;;  %v3436_v58 = vpop.eup %3435 }
 0x137   :  { %3447 = vrcp.f32 %v412_v42  ;;  %v3438_v61 = vpop.eup %3437  ;;  %v544_v63 = vmul.f32 %v3436_v58, %v3434_v34  ;;  %v565_v34 = vld [vmem:[#allocation4 + $0x20] sm:$0xff] }
 0x138   :  { %v538_v36 = vadd.f32 1.0, %v3438_v61  ;;  %v618_v58 = vrot.slane %v565_v34, 4  ;;  %v567_v61 = vld [vmem:[#allocation4 + $0x30] sm:$0xff] }
 0x13a   :  { %3449 = vrcp.f32 %v538_v36 }
 0x140   :  { %v3440_v44 = vpop.eup %3439 }
 0x141   :  { %v3442_v62 = vpop.eup %3441  ;;  %v546_v19 = vmul.f32 0.0, %v3440_v44  ;;  %v622_v44 = vunpack.c.l.bf16 %v618_v58 }
 0x142   :  { %v3444_v35 = vpop.eup %3443  ;;  %v539_v40 = vadd.f32 1.0, %v3442_v62  ;;  %v619_v62 = vrot.slane %v567_v61, 4 }
 0x143   :  { %v3446_v37 = vpop.eup %3445  ;;  %v3988_v39 = vadd.f32 %v546_v19, %v544_v63 }
 0x144   :  { %v3448_v38 = vpop.eup %3447  ;;  %v545_v41 = vmul.f32 %v3446_v37, %v3444_v35  ;;  %v623_v19 = vunpack.c.l.bf16 %v619_v62  ;;  %v566_v37 = vld [vmem:[#allocation4 + $0x28] sm:$0xff]  ;;  %v569_v62 = vunpack.c.l.bf16 %v565_v34 }
 0x145   :  { %v547_v43 = vmul.f32 0.0, %v3448_v38  ;;  %3451 = vtanh.f32 %v3988_v39  ;;  %v679_v38 = vunpack.c.l.bf16 %v566_v37 }
 0x146   :  { %3453 = vrcp.f32 %v539_v40 }
 0x147   :  { %v3991_v45 = vadd.f32 %v547_v43, %v545_v41  ;;  %v3450_v46 = vpop.eup %3449 }
 0x149   :  { %3455 = vtanh.f32 %v3991_v45 }
 0x152   :  { %v3452_v47 = vpop.eup %3451 }
 0x153   :  { %v3454_v48 = vpop.eup %3453  ;;  %v552_v51 = vmul.f32 %v3452_v47, %v3450_v46  ;;  %v568_v46 = vld [vmem:[#allocation4 + $0x38] sm:$0xff] }
 0x156   :  { %v3456_v50 = vpop.eup %3455 }
 0x157   :  { %v553_v52 = vmul.f32 %v3456_v50, %v3454_v48  ;;  %v680_v48 = vunpack.c.l.bf16 %v568_v46 }
 0x159   :  { %v563_v54 = vpack.c.bf16 %v553_v52, %v552_v51 }
 0x15b   :  { %2840 = vmatmul.mubr.bf16.vlgmr.msra.gmra.mxu0 %v563_v54  ;;  %2860 = vmatmul.mubr.bf16.vlgmr.msra.gmra.mxu1 %v563_v54 }
 0x15c   :  { %2864 = vmatpush3.bf16.msra.mxu0 %v3881_v17  ;;  %2884 = vmatpush3.bf16.msra.mxu1 %v3885_v18 }
 0x15d   :  { %2865 = vmatprep.subr.bf16.mxu0 %v3787_v0  ;;  %2885 = vmatprep.subr.bf16.mxu1 %v3787_v0 }
 0x15e   :  { %2879 = vmatprep.mubr.msk.bf16.mxu0 %vm3788_vm0, %v3787_v0  ;;  %2899 = vmatprep.mubr.msk.bf16.mxu1 %vm3788_vm0, %v3787_v0 }
 0x160   :  { %2866 = vmatpush3.bf16.msra.mxu0 %v3889_v20  ;;  %2886 = vmatpush3.bf16.msra.mxu1 %v3893_v21 }
 0x161   :  { %2867 = vmatprep.subr.bf16.mxu0 %v3787_v0  ;;  %2887 = vmatprep.subr.bf16.mxu1 %v3787_v0 }
 0x164   :  { %2868 = vmatpush3.bf16.msra.mxu0 %v3901_v22  ;;  %2888 = vmatpush3.bf16.msra.mxu1 %v3905_v23 }
 0x165   :  { %2869 = vmatprep.subr.bf16.mxu0 %v3787_v0  ;;  %2889 = vmatprep.subr.bf16.mxu1 %v3787_v0 }
 0x168   :  { %2870 = vmatpush3.bf16.msra.mxu0 %v3909_v24  ;;  %2890 = vmatpush3.bf16.msra.mxu1 %v3913_v25 }
 0x169   :  { %2871 = vmatprep.subr.bf16.mxu0 %v3787_v0  ;;  %2891 = vmatprep.subr.bf16.mxu1 %v3787_v0 }
 0x16c   :  { %2872 = vmatpush3.bf16.msra.mxu0 %v3917_v26  ;;  %2892 = vmatpush3.bf16.msra.mxu1 %v3921_v27 }
 0x16d   :  { %2873 = vmatprep.subr.bf16.mxu0 %v3787_v0  ;;  %2893 = vmatprep.subr.bf16.mxu1 %v3787_v0 }
 0x170   :  { %2874 = vmatpush3.bf16.msra.mxu0 %v3925_v28  ;;  %2894 = vmatpush3.bf16.msra.mxu1 %v3929_v29 }
 0x171   :  { %2875 = vmatprep.subr.bf16.mxu0 %v3787_v0  ;;  %2895 = vmatprep.subr.bf16.mxu1 %v3787_v0 }
 0x174   :  { %2876 = vmatpush3.bf16.msra.mxu0 %v3933_v30  ;;  %2896 = vmatpush3.bf16.msra.mxu1 %v3937_v31 }
 0x175   :  { %2877 = vmatprep.subr.bf16.mxu0 %v3787_v0  ;;  %2897 = vmatprep.subr.bf16.mxu1 %v3787_v0 }
 0x178   :  { %2878 = vmatpush3.bf16.msra.mxu0 %v3941_v32  ;;  %2898 = vmatpush3.bf16.msra.mxu1 %v3945_v33 }
 0x179   :  { %2903 = vmatprep.subr.bf16.mxu0 %v3787_v0  ;;  %2923 = vmatprep.subr.bf16.mxu1 %v3787_v0 }
 0x17b   :  { %2880 = vmatmul.mubr.bf16.vlgmr.msra.gmra.mxu0 %v563_v54  ;;  %2900 = vmatmul.mubr.bf16.vlgmr.msra.gmra.mxu1 %v563_v54  ;;  %v738_v54 = vrot.slane %v566_v37, 4 }
 0x17c   :  { %2904 = vmatpush3.bf16.msra.mxu0 %v3820_v1  ;;  %2924 = vmatpush3.bf16.msra.mxu1 %v3822_v2 }
 0x17d   :  { %2905 = vmatprep.subr.bf16.mxu0 %v3787_v0  ;;  %2925 = vmatprep.subr.bf16.mxu1 %v3787_v0 }
 0x17e   :  { %2919 = vmatprep.mubr.msk.bf16.mxu0 %vm3788_vm0, %v3787_v0  ;;  %2939 = vmatprep.mubr.msk.bf16.mxu1 %vm3788_vm0, %v3787_v0 }
 0x180   :  { %2906 = vmatpush3.bf16.msra.mxu0 %v3825_v3  ;;  %2926 = vmatpush3.bf16.msra.mxu1 %v3829_v4 }
 0x181   :  { %2907 = vmatprep.subr.bf16.mxu0 %v3787_v0  ;;  %2927 = vmatprep.subr.bf16.mxu1 %v3787_v0 }
 0x184   :  { %2908 = vmatpush3.bf16.msra.mxu0 %v3833_v5  ;;  %2928 = vmatpush3.bf16.msra.mxu1 %v3837_v6 }
 0x185   :  { %2909 = vmatprep.subr.bf16.mxu0 %v3787_v0  ;;  %2929 = vmatprep.subr.bf16.mxu1 %v3787_v0 }
 0x188   :  { %2910 = vmatpush3.bf16.msra.mxu0 %v3841_v7  ;;  %2930 = vmatpush3.bf16.msra.mxu1 %v3845_v8 }
 0x189   :  { %2911 = vmatprep.subr.bf16.mxu0 %v3787_v0  ;;  %2931 = vmatprep.subr.bf16.mxu1 %v3787_v0 }
 0x18c   :  { %2912 = vmatpush3.bf16.msra.mxu0 %v3849_v9  ;;  %2932 = vmatpush3.bf16.msra.mxu1 %v3853_v10 }
 0x18d   :  { %2913 = vmatprep.subr.bf16.mxu0 %v3787_v0  ;;  %2933 = vmatprep.subr.bf16.mxu1 %v3787_v0 }
 0x190   :  { %2914 = vmatpush3.bf16.msra.mxu0 %v3857_v11  ;;  %2934 = vmatpush3.bf16.msra.mxu1 %v3861_v12 }
 0x191   :  { %2915 = vmatprep.subr.bf16.mxu0 %v3787_v0  ;;  %2935 = vmatprep.subr.bf16.mxu1 %v3787_v0 }
 0x194   :  { %2916 = vmatpush3.bf16.msra.mxu0 %v3865_v13  ;;  %2936 = vmatpush3.bf16.msra.mxu1 %v3869_v14 }
 0x195   :  { %2917 = vmatprep.subr.bf16.mxu0 %v3787_v0  ;;  %2937 = vmatprep.subr.bf16.mxu1 %v3787_v0 }
 0x198   :  { %2918 = vmatpush3.bf16.msra.mxu0 %v3873_v15  ;;  %2938 = vmatpush3.bf16.msra.mxu1 %v3877_v16 }
 0x199   :  { %2943 = vmatprep.subr.bf16.mxu0 %v3787_v0  ;;  %2963 = vmatprep.subr.bf16.mxu1 %v3787_v0 }
 0x21b   :  { %v605_v55 = vpop.f32.mrf.mxu0  ;;  %v658_v49 = vpop.f32.mrf.mxu1 }
 0x21c   :  { %v665_v63 = vadd.f32 %v658_v49, %v622_v44  ;;  %v742_v44 = vunpack.c.l.bf16 %v738_v54 }
 0x21d   :  { %v2841_v56 = vpop.f32.mrf.mxu0  ;;  %v2861_v57 = vpop.f32.mrf.mxu1 }
 0x21e   :  { %v2413_v35 = vmul.f32 -1.442695, %v665_v63 }
 0x21f   :  { %v608_v53 = vpop.f32.mrf.mxu0  ;;  %v661_v59 = vpop.f32.mrf.mxu1 }
 0x220   :  { %v666_v36 = vadd.f32 %v661_v59, %v623_v19  ;;  %3457 = vpow2.f32 %v2413_v35 }
 0x221   :  { %v2842_v60 = vpop.f32.mrf.mxu0  ;;  %v2862_v42 = vpop.f32.mrf.mxu1 }
 0x222   :  { %v2414_v40 = vmul.f32 -1.442695, %v666_v36  ;;  %v739_v60 = vrot.slane %v568_v46, 4  ;;  %v612_v36 = vadd.f32 %v605_v55, %v569_v62 }
 0x224   :  { %3459 = vpow2.f32 %v2414_v40  ;;  %v743_v63 = vunpack.c.l.bf16 %v739_v60 }
 0x22d   :  { %v3458_v19 = vpop.eup %3457 }
 0x231   :  { %v3460_v40 = vpop.eup %3459 }
 0x232   :  { %v674_v46 = vadd.f32 1.0, %v3460_v40 }
 0x23b   :  { %v715_v41 = vpop.f32.mrf.mxu0  ;;  %v778_v43 = vpop.f32.mrf.mxu1 }
 0x23c   :  { %v722_v47 = vadd.f32 %v715_v41, %v679_v38  ;;  %v785_v35 = vadd.f32 %v778_v43, %v742_v44  ;;  %v673_v41 = vadd.f32 1.0, %v3458_v19 }
 0x23d   :  { %v2881_v50 = vpop.f32.mrf.mxu0  ;;  %v2901_v51 = vpop.f32.mrf.mxu1 }
 0x23e   :  { %v2415_v52 = vmul.f32 -1.442695, %v722_v47  ;;  %v570_v47 = vunpack.c.l.bf16 %v567_v61  ;;  %v2417_v37 = vmul.f32 -1.442695, %v785_v35 }
 0x23f   :  { %v718_v56 = vpop.f32.mrf.mxu0  ;;  %v781_v57 = vpop.f32.mrf.mxu1 }
 0x240   :  { %3461 = vpow2.f32 %v2415_v52  ;;  %v723_v49 = vadd.f32 %v718_v56, %v680_v48  ;;  %v786_v38 = vadd.f32 %v781_v57, %v743_v63  ;;  %v613_v52 = vadd.f32 %v608_v53, %v570_v47 }
 0x241   :  { %v2882_v59 = vpop.f32.mrf.mxu0  ;;  %v2902_v42 = vpop.f32.mrf.mxu1 }
 0x242   :  { %v2416_v58 = vmul.f32 -1.442695, %v723_v49  ;;  %v2418_v51 = vmul.f32 -1.442695, %v786_v38 }
 0x244   :  { %3463 = vpow2.f32 %v2416_v58 }
 0x245   :  { %3465 = vtanh.f32 %v612_v36 }
 0x246   :  { %3467 = vrcp.f32 %v673_v41 }
 0x247   :  { %3469 = vpow2.f32 %v2417_v37 }
 0x24d   :  { %v3462_v50 = vpop.eup %3461 }
 0x24e   :  { %v730_v48 = vadd.f32 1.0, %v3462_v50 }
 0x250   :  { %3471 = vrcp.f32 %v730_v48 }
 0x251   :  { %v3464_v54 = vpop.eup %3463  ;;  %3473 = vpow2.f32 %v2418_v51  ;;  %v823_v51 = vld [vmem:[#allocation4 + $0x58] sm:$0xff] }
 0x252   :  { %3475 = vrcp.f32 %v674_v46  ;;  %v731_v34 = vadd.f32 1.0, %v3464_v54  ;;  %v3466_v55 = vpop.eup %3465  ;;  %v935_v48 = vunpack.c.l.bf16 %v823_v51 }
 0x253   :  { %3477 = vtanh.f32 %v613_v52  ;;  %v3468_v43 = vpop.eup %3467 }
 0x254   :  { %3479 = vrcp.f32 %v731_v34  ;;  %v3470_v56 = vpop.eup %3469  ;;  %v799_v49 = vmul.f32 %v3468_v43, %v3466_v55 }
 0x255   :  { %v793_v42 = vadd.f32 1.0, %v3470_v56 }
 0x257   :  { %3481 = vrcp.f32 %v793_v42 }
 0x25d   :  { %v3472_v61 = vpop.eup %3471 }
 0x25e   :  { %v3474_v57 = vpop.eup %3473  ;;  %v801_v60 = vmul.f32 %v3472_v61, %v3988_v39 }
 0x25f   :  { %v3476_v59 = vpop.eup %3475  ;;  %v794_v62 = vadd.f32 1.0, %v3474_v57  ;;  %v994_v57 = vrot.slane %v823_v51, 4 }
 0x260   :  { %v3478_v58 = vpop.eup %3477  ;;  %v4067_v53 = vadd.f32 %v801_v60, %v799_v49 }
 0x261   :  { %v3480_v44 = vpop.eup %3479  ;;  %v800_v63 = vmul.f32 %v3478_v58, %v3476_v59 }
 0x262   :  { %v802_v19 = vmul.f32 %v3480_v44, %v3991_v45  ;;  %3483 = vtanh.f32 %v4067_v53  ;;  %v998_v44 = vunpack.c.l.bf16 %v994_v57  ;;  %v4258_v57 = vld [vmem:[#allocation7] ss:$16 sps:$4 sm:$0xff]  }
 0x263   :  { %3485 = vrcp.f32 %v794_v62 }
 0x264   :  { %v4070_v35 = vadd.f32 %v802_v19, %v800_v63  ;;  %v3482_v36 = vpop.eup %3481 }
 0x266   :  { %3487 = vtanh.f32 %v4070_v35 }
 0x26f   :  { %v3484_v39 = vpop.eup %3483 }
 0x270   :  { %v3486_v38 = vpop.eup %3485  ;;  %v807_v40 = vmul.f32 %v3484_v39, %v3482_v36 }
 0x273   :  { %v3488_v41 = vpop.eup %3487 }
 0x274   :  { %v808_v47 = vmul.f32 %v3488_v41, %v3486_v38 }
 0x276   :  { %v818_v37 = vpack.c.bf16 %v808_v47, %v807_v40 }
 0x278   :  { %2920 = vmatmul.mubr.bf16.vlgmr.msra.gmra.mxu0 %v818_v37  ;;  %2940 = vmatmul.mubr.bf16.vlgmr.msra.gmra.mxu1 %v818_v37 }
 0x279   :  { %2944 = vmatpush3.bf16.msra.mxu0 %v3881_v17  ;;  %2964 = vmatpush3.bf16.msra.mxu1 %v3885_v18  ;;  %v821_v18 = vld [vmem:[#allocation4 + $0x48] sm:$0xff] }
 0x27a   :  { %2945 = vmatprep.subr.bf16.mxu0 %v3787_v0  ;;  %2965 = vmatprep.subr.bf16.mxu1 %v3787_v0  ;;  %v993_v55 = vrot.slane %v821_v18, 4 }
 0x27b   :  { %2959 = vmatprep.mubr.msk.bf16.mxu0 %vm3788_vm0, %v3787_v0  ;;  %2979 = vmatprep.mubr.msk.bf16.mxu1 %vm3788_vm0, %v3787_v0 }
 0x27c   :  { %v997_v42 = vunpack.c.l.bf16 %v993_v55  ;;  %v4166_v55 = vld [vmem:[#allocation7 + $0xc8] ss:$16 sps:$4 sm:$0xff]  }
 0x27d   :  { %2946 = vmatpush3.bf16.msra.mxu0 %v3889_v20  ;;  %2966 = vmatpush3.bf16.msra.mxu1 %v3893_v21  ;;  %v934_v20 = vunpack.c.l.bf16 %v821_v18 }
 0x27e   :  { %2947 = vmatprep.subr.bf16.mxu0 %v3787_v0  ;;  %2967 = vmatprep.subr.bf16.mxu1 %v3787_v0 }
 0x281   :  { %2948 = vmatpush3.bf16.msra.mxu0 %v3901_v22  ;;  %2968 = vmatpush3.bf16.msra.mxu1 %v3905_v23 }
 0x282   :  { %2949 = vmatprep.subr.bf16.mxu0 %v3787_v0  ;;  %2969 = vmatprep.subr.bf16.mxu1 %v3787_v0 }
 0x285   :  { %2950 = vmatpush3.bf16.msra.mxu0 %v3909_v24  ;;  %2970 = vmatpush3.bf16.msra.mxu1 %v3913_v25 }
 0x286   :  { %2951 = vmatprep.subr.bf16.mxu0 %v3787_v0  ;;  %2971 = vmatprep.subr.bf16.mxu1 %v3787_v0 }
 0x289   :  { %2952 = vmatpush3.bf16.msra.mxu0 %v3917_v26  ;;  %2972 = vmatpush3.bf16.msra.mxu1 %v3921_v27 }
 0x28a   :  { %2953 = vmatprep.subr.bf16.mxu0 %v3787_v0  ;;  %2973 = vmatprep.subr.bf16.mxu1 %v3787_v0 }
 0x28d   :  { %2954 = vmatpush3.bf16.msra.mxu0 %v3925_v28  ;;  %2974 = vmatpush3.bf16.msra.mxu1 %v3929_v29 }
 0x28e   :  { %2955 = vmatprep.subr.bf16.mxu0 %v3787_v0  ;;  %2975 = vmatprep.subr.bf16.mxu1 %v3787_v0 }
 0x291   :  { %2956 = vmatpush3.bf16.msra.mxu0 %v3933_v30  ;;  %2976 = vmatpush3.bf16.msra.mxu1 %v3937_v31 }
 0x292   :  { %2957 = vmatprep.subr.bf16.mxu0 %v3787_v0  ;;  %2977 = vmatprep.subr.bf16.mxu1 %v3787_v0 }
 0x295   :  { %2958 = vmatpush3.bf16.msra.mxu0 %v3941_v32  ;;  %2978 = vmatpush3.bf16.msra.mxu1 %v3945_v33 }
 0x296   :  { %2983 = vmatprep.subr.bf16.mxu0 %v3787_v0  ;;  %3003 = vmatprep.subr.bf16.mxu1 %v3787_v0 }
 0x298   :  { %2960 = vmatmul.mubr.bf16.vlgmr.msra.gmra.mxu0 %v818_v37  ;;  %2980 = vmatmul.mubr.bf16.vlgmr.msra.gmra.mxu1 %v818_v37 }
 0x299   :  { %2984 = vmatpush3.bf16.msra.mxu0 %v3820_v1  ;;  %3004 = vmatpush3.bf16.msra.mxu1 %v3822_v2 }
 0x29a   :  { %2985 = vmatprep.subr.bf16.mxu0 %v3787_v0  ;;  %3005 = vmatprep.subr.bf16.mxu1 %v3787_v0 }
 0x29b   :  { %2999 = vmatprep.mubr.msk.bf16.mxu0 %vm3788_vm0, %v3787_v0  ;;  %3019 = vmatprep.mubr.msk.bf16.mxu1 %vm3788_vm0, %v3787_v0 }
 0x29d   :  { %2986 = vmatpush3.bf16.msra.mxu0 %v3825_v3  ;;  %3006 = vmatpush3.bf16.msra.mxu1 %v3829_v4 }
 0x29e   :  { %2987 = vmatprep.subr.bf16.mxu0 %v3787_v0  ;;  %3007 = vmatprep.subr.bf16.mxu1 %v3787_v0 }
 0x2a1   :  { %2988 = vmatpush3.bf16.msra.mxu0 %v3833_v5  ;;  %3008 = vmatpush3.bf16.msra.mxu1 %v3837_v6 }
 0x2a2   :  { %2989 = vmatprep.subr.bf16.mxu0 %v3787_v0  ;;  %3009 = vmatprep.subr.bf16.mxu1 %v3787_v0 }
 0x2a5   :  { %2990 = vmatpush3.bf16.msra.mxu0 %v3841_v7  ;;  %3010 = vmatpush3.bf16.msra.mxu1 %v3845_v8 }
 0x2a6   :  { %2991 = vmatprep.subr.bf16.mxu0 %v3787_v0  ;;  %3011 = vmatprep.subr.bf16.mxu1 %v3787_v0 }
 0x2a9   :  { %2992 = vmatpush3.bf16.msra.mxu0 %v3849_v9  ;;  %3012 = vmatpush3.bf16.msra.mxu1 %v3853_v10  ;;  %v820_v9 = vld [vmem:[#allocation4 + $0x40] sm:$0xff] }
 0x2aa   :  { %2993 = vmatprep.subr.bf16.mxu0 %v3787_v0  ;;  %3013 = vmatprep.subr.bf16.mxu1 %v3787_v0  ;;  %v873_v10 = vrot.slane %v820_v9, 4  ;;  %v824_v58 = vunpack.c.l.bf16 %v820_v9 }
 0x2ad   :  { %2994 = vmatpush3.bf16.msra.mxu0 %v3857_v11  ;;  %3014 = vmatpush3.bf16.msra.mxu1 %v3861_v12  ;;  %v822_v11 = vld [vmem:[#allocation4 + $0x50] sm:$0xff]  ;;  %v877_v12 = vunpack.c.l.bf16 %v873_v10 }
 0x2ae   :  { %2995 = vmatprep.subr.bf16.mxu0 %v3787_v0  ;;  %3015 = vmatprep.subr.bf16.mxu1 %v3787_v0  ;;  %v825_v41 = vunpack.c.l.bf16 %v822_v11 }
 0x2b1   :  { %2996 = vmatpush3.bf16.msra.mxu0 %v3865_v13  ;;  %3016 = vmatpush3.bf16.msra.mxu1 %v3869_v14  ;;  %v874_v13 = vrot.slane %v822_v11, 4 }
 0x2b2   :  { %2997 = vmatprep.subr.bf16.mxu0 %v3787_v0  ;;  %3017 = vmatprep.subr.bf16.mxu1 %v3787_v0 }
 0x2b5   :  { %2998 = vmatpush3.bf16.msra.mxu0 %v3873_v15  ;;  %3018 = vmatpush3.bf16.msra.mxu1 %v3877_v16  ;;  %v878_v15 = vunpack.c.l.bf16 %v874_v13 }
 0x2b6   :  { %3023 = vmatprep.subr.bf16.mxu0 %v3787_v0  ;;  %3043 = vmatprep.subr.bf16.mxu1 %v3787_v0 }
 0x338   :  { %v860_v1 = vpop.f32.mrf.mxu0  ;;  %v913_v2 = vpop.f32.mrf.mxu1 }
 0x339   :  { %v920_v14 = vadd.f32 %v913_v2, %v877_v12  ;;  %v867_v19 = vadd.f32 %v860_v1, %v824_v58 }
 0x33a   :  { %v2921_v3 = vpop.f32.mrf.mxu0  ;;  %v2941_v4 = vpop.f32.mrf.mxu1 }
 0x33b   :  { %v2419_v16 = vmul.f32 -1.442695, %v920_v14 }
 0x33c   :  { %v863_v5 = vpop.f32.mrf.mxu0  ;;  %v916_v6 = vpop.f32.mrf.mxu1 }
 0x33d   :  { %v921_v17 = vadd.f32 %v916_v6, %v878_v15  ;;  %3489 = vpow2.f32 %v2419_v16  ;;  %v868_v4 = vadd.f32 %v863_v5, %v825_v41 }
 0x33e   :  { %v2922_v7 = vpop.f32.mrf.mxu0  ;;  %v2942_v8 = vpop.f32.mrf.mxu1 }
 0x33f   :  { %v2420_v21 = vmul.f32 -1.442695, %v921_v17 }
 0x341   :  { %3491 = vpow2.f32 %v2420_v21 }
 0x34a   :  { %v3490_v62 = vpop.eup %3489 }
 0x34b   :  { %v928_v39 = vadd.f32 1.0, %v3490_v62 }
 0x34e   :  { %v3492_v38 = vpop.eup %3491 }
 0x34f   :  { %v929_v2 = vadd.f32 1.0, %v3492_v38  ;;  %v1077_v38 = vld [vmem:[#allocation4 + $0x70] sm:$0xff] }
 0x358   :  { %v970_v45 = vpop.f32.mrf.mxu0  ;;  %v1033_v50 = vpop.f32.mrf.mxu1 }
 0x359   :  { %v977_v46 = vadd.f32 %v970_v45, %v934_v20  ;;  %v1040_v63 = vadd.f32 %v1033_v50, %v997_v42 }
 0x35a   :  { %v2961_v52 = vpop.f32.mrf.mxu0  ;;  %v2981_v54 = vpop.f32.mrf.mxu1 }
 0x35b   :  { %v2421_v34 = vmul.f32 -1.442695, %v977_v46  ;;  %v2423_v40 = vmul.f32 -1.442695, %v1040_v63 }
 0x35c   :  { %v973_v43 = vpop.f32.mrf.mxu0  ;;  %v1036_v56 = vpop.f32.mrf.mxu1 }
 0x35d   :  { %3493 = vpow2.f32 %v2421_v34  ;;  %v978_v61 = vadd.f32 %v973_v43, %v935_v48  ;;  %v1041_v36 = vadd.f32 %v1036_v56, %v998_v44  ;;  %v4154_v34 = vld [vmem:[#allocation7 + $0xe8] ss:$16 sps:$4 sm:$0xff]   ;;  %v4169_v43 = vld [vmem:[#allocation7 + $0xcc] ss:$16 sps:$4 sm:$0xff]   ;;  %v4250_v56 = vld [vmem:[#allocation7 + $0x20] ss:$16 sps:$4 sm:$0xff]  }
 0x35e   :  { %v2962_v49 = vpop.f32.mrf.mxu0  ;;  %v2982_v60 = vpop.f32.mrf.mxu1 }
 0x35f   :  { %v2422_v59 = vmul.f32 -1.442695, %v978_v61  ;;  %v2424_v37 = vmul.f32 -1.442695, %v1041_v36  ;;  %v4253_v61 = vld [vmem:[#allocation7 + $0x24] ss:$16 sps:$4 sm:$0xff]  }
 0x360   :  { %v4261_v49 = vld [vmem:[#allocation7 + $0x4] ss:$16 sps:$4 sm:$0xff]  }
 0x361   :  { %3495 = vpow2.f32 %v2422_v59  ;;  %v1075_v36 = vld [vmem:[#allocation4 + $0x60] sm:$0xff] }
 0x362   :  { %3497 = vtanh.f32 %v867_v19 }
 0x363   :  { %3499 = vrcp.f32 %v928_v39  ;;  %v1128_v39 = vrot.slane %v1075_v36, 4 }
 0x364   :  { %3501 = vpow2.f32 %v2423_v40  ;;  %v1129_v40 = vrot.slane %v1077_v38, 4 }
 0x365   :  { %v1132_v41 = vunpack.c.l.bf16 %v1128_v39 }
 0x36a   :  { %v3494_v47 = vpop.eup %3493 }
 0x36b   :  { %v985_v3 = vadd.f32 1.0, %v3494_v47 }
 0x36d   :  { %3503 = vrcp.f32 %v985_v3 }
 0x36e   :  { %v3496_v6 = vpop.eup %3495  ;;  %3505 = vpow2.f32 %v2424_v37  ;;  %v1133_v37 = vunpack.c.l.bf16 %v1129_v40 }
 0x36f   :  { %3507 = vrcp.f32 %v929_v2  ;;  %v986_v7 = vadd.f32 1.0, %v3496_v6  ;;  %v3498_v1 = vpop.eup %3497 }
 0x370   :  { %3509 = vtanh.f32 %v868_v4  ;;  %v3500_v8 = vpop.eup %3499  ;;  %v1076_v4 = vld [vmem:[#allocation4 + $0x68] sm:$0xff] }
 0x371   :  { %3511 = vrcp.f32 %v986_v7  ;;  %v3502_v9 = vpop.eup %3501  ;;  %v1054_v12 = vmul.f32 %v3500_v8, %v3498_v1  ;;  %v1189_v6 = vunpack.c.l.bf16 %v1076_v4 }
 0x372   :  { %v1048_v15 = vadd.f32 1.0, %v3502_v9  ;;  %v1078_v9 = vld [vmem:[#allocation4 + $0x78] sm:$0xff] }
 0x374   :  { %3513 = vrcp.f32 %v1048_v15  ;;  %v1248_v15 = vrot.slane %v1076_v4, 4 }
 0x37a   :  { %v3504_v10 = vpop.eup %3503 }
 0x37b   :  { %v3506_v11 = vpop.eup %3505  ;;  %v1056_v13 = vmul.f32 %v3504_v10, %v4067_v53 }
 0x37c   :  { %v3508_v14 = vpop.eup %3507  ;;  %v1049_v18 = vadd.f32 1.0, %v3506_v11  ;;  %v1190_v11 = vunpack.c.l.bf16 %v1078_v9 }
 0x37d   :  { %v3510_v16 = vpop.eup %3509  ;;  %v4147_v5 = vadd.f32 %v1056_v13, %v1054_v12 }
 0x37e   :  { %v3512_v17 = vpop.eup %3511  ;;  %v1055_v20 = vmul.f32 %v3510_v16, %v3508_v14 }
 0x37f   :  { %v1057_v21 = vmul.f32 %v3512_v17, %v4070_v35  ;;  %3515 = vtanh.f32 %v4147_v5  ;;  %v4157_v35 = vld [vmem:[#allocation7 + $0xec] ss:$16 sps:$4 sm:$0xff]  }
 0x380   :  { %3517 = vrcp.f32 %v1049_v18 }
 0x381   :  { %v4150_v45 = vadd.f32 %v1057_v21, %v1055_v20  ;;  %v3514_v50 = vpop.eup %3513  ;;  %v1249_v20 = vrot.slane %v1078_v9, 4 }
 0x383   :  { %3519 = vtanh.f32 %v4150_v45 }
 0x38c   :  { %v3516_v53 = vpop.eup %3515 }
 0x38d   :  { %v3518_v51 = vpop.eup %3517  ;;  %v1062_v48 = vmul.f32 %v3516_v53, %v3514_v50 }
 0x390   :  { %v3520_v46 = vpop.eup %3519 }
 0x391   :  { %v1063_v52 = vmul.f32 %v3520_v46, %v3518_v51  ;;  %v1252_v51 = vunpack.c.l.bf16 %v1248_v15  ;;  %v1079_v46 = vunpack.c.l.bf16 %v1075_v36 }
 0x393   :  { %v1073_v54 = vpack.c.bf16 %v1063_v52, %v1062_v48  ;;  %v1253_v48 = vunpack.c.l.bf16 %v1249_v20 }
 0x395   :  { %3000 = vmatmul.mubr.bf16.vlgmr.msra.gmra.mxu0 %v1073_v54  ;;  %3020 = vmatmul.mubr.bf16.vlgmr.msra.gmra.mxu1 %v1073_v54 }
 0x396   :  { %3024 = vmatpush3.bf16.msra.mxu0 %v4154_v34  ;;  %3044 = vmatpush3.bf16.msra.mxu1 %v4157_v35 }
 0x397   :  { %3025 = vmatprep.subr.bf16.mxu0 %v3787_v0  ;;  %3045 = vmatprep.subr.bf16.mxu1 %v3787_v0 }
 0x398   :  { %3039 = vmatprep.mubr.msk.bf16.mxu0 %vm3788_vm0, %v3787_v0  ;;  %3059 = vmatprep.mubr.msk.bf16.mxu1 %vm3788_vm0, %v3787_v0 }
 0x39a   :  { %3026 = vmatpush3.bf16.msra.mxu0 %v4166_v55  ;;  %3046 = vmatpush3.bf16.msra.mxu1 %v4169_v43 }
 0x39b   :  { %3027 = vmatprep.subr.bf16.mxu0 %v3787_v0  ;;  %3047 = vmatprep.subr.bf16.mxu1 %v3787_v0 }
 0x39e   :  { %3028 = vmatpush3.bf16.msra.mxu0 %v3901_v22  ;;  %3048 = vmatpush3.bf16.msra.mxu1 %v3905_v23  ;;  %v4198_v22 = vld [vmem:[#allocation7 + $0xe0] ss:$16 sps:$4 sm:$0xff]   ;;  %v4201_v23 = vld [vmem:[#allocation7 + $0xe4] ss:$16 sps:$4 sm:$0xff]  }
 0x39f   :  { %3029 = vmatprep.subr.bf16.mxu0 %v3787_v0  ;;  %3049 = vmatprep.subr.bf16.mxu1 %v3787_v0 }
 0x3a2   :  { %3030 = vmatpush3.bf16.msra.mxu0 %v3909_v24  ;;  %3050 = vmatpush3.bf16.msra.mxu1 %v3913_v25  ;;  %v4210_v24 = vld [vmem:[#allocation7 + $0xc0] ss:$16 sps:$4 sm:$0xff]   ;;  %v4213_v25 = vld [vmem:[#allocation7 + $0xc4] ss:$16 sps:$4 sm:$0xff]  }
 0x3a3   :  { %3031 = vmatprep.subr.bf16.mxu0 %v3787_v0  ;;  %3051 = vmatprep.subr.bf16.mxu1 %v3787_v0 }
 0x3a6   :  { %3032 = vmatpush3.bf16.msra.mxu0 %v3917_v26  ;;  %3052 = vmatpush3.bf16.msra.mxu1 %v3921_v27  ;;  %v4218_v26 = vld [vmem:[#allocation7 + $0xa0] ss:$16 sps:$4 sm:$0xff]   ;;  %v4221_v27 = vld [vmem:[#allocation7 + $0xa4] ss:$16 sps:$4 sm:$0xff]  }
 0x3a7   :  { %3033 = vmatprep.subr.bf16.mxu0 %v3787_v0  ;;  %3053 = vmatprep.subr.bf16.mxu1 %v3787_v0 }
 0x3aa   :  { %3034 = vmatpush3.bf16.msra.mxu0 %v3925_v28  ;;  %3054 = vmatpush3.bf16.msra.mxu1 %v3929_v29  ;;  %v4226_v28 = vld [vmem:[#allocation7 + $0x80] ss:$16 sps:$4 sm:$0xff]   ;;  %v4229_v29 = vld [vmem:[#allocation7 + $0x84] ss:$16 sps:$4 sm:$0xff]  }
 0x3ab   :  { %3035 = vmatprep.subr.bf16.mxu0 %v3787_v0  ;;  %3055 = vmatprep.subr.bf16.mxu1 %v3787_v0 }
 0x3ae   :  { %3036 = vmatpush3.bf16.msra.mxu0 %v3933_v30  ;;  %3056 = vmatpush3.bf16.msra.mxu1 %v3937_v31  ;;  %v4234_v30 = vld [vmem:[#allocation7 + $0x60] ss:$16 sps:$4 sm:$0xff]   ;;  %v4237_v31 = vld [vmem:[#allocation7 + $0x64] ss:$16 sps:$4 sm:$0xff]  }
 0x3af   :  { %3037 = vmatprep.subr.bf16.mxu0 %v3787_v0  ;;  %3057 = vmatprep.subr.bf16.mxu1 %v3787_v0 }
 0x3b2   :  { %3038 = vmatpush3.bf16.msra.mxu0 %v3941_v32  ;;  %3058 = vmatpush3.bf16.msra.mxu1 %v3945_v33  ;;  %v4242_v32 = vld [vmem:[#allocation7 + $0x40] ss:$16 sps:$4 sm:$0xff]   ;;  %v4245_v33 = vld [vmem:[#allocation7 + $0x44] ss:$16 sps:$4 sm:$0xff]  }
 0x3b3   :  { %3063 = vmatprep.subr.bf16.mxu0 %v3787_v0  ;;  %3083 = vmatprep.subr.bf16.mxu1 %v3787_v0 }
 0x3b5   :  { %3040 = vmatmul.mubr.bf16.vlgmr.msra.gmra.mxu0 %v1073_v54  ;;  %3060 = vmatmul.mubr.bf16.vlgmr.msra.gmra.mxu1 %v1073_v54 }
 0x3b6   :  { %3064 = vmatpush3.bf16.msra.mxu0 %v4198_v22  ;;  %3084 = vmatpush3.bf16.msra.mxu1 %v4201_v23 }
 0x3b7   :  { %3065 = vmatprep.subr.bf16.mxu0 %v3787_v0  ;;  %3085 = vmatprep.subr.bf16.mxu1 %v3787_v0 }
 0x3b8   :  { %3079 = vmatprep.mubr.msk.bf16.mxu0 %vm3788_vm0, %v3787_v0  ;;  %3099 = vmatprep.mubr.msk.bf16.mxu1 %vm3788_vm0, %v3787_v0 }
 0x3ba   :  { %3066 = vmatpush3.bf16.msra.mxu0 %v4210_v24  ;;  %3086 = vmatpush3.bf16.msra.mxu1 %v4213_v25 }
 0x3bb   :  { %3067 = vmatprep.subr.bf16.mxu0 %v3787_v0  ;;  %3087 = vmatprep.subr.bf16.mxu1 %v3787_v0 }
 0x3be   :  { %3068 = vmatpush3.bf16.msra.mxu0 %v4218_v26  ;;  %3088 = vmatpush3.bf16.msra.mxu1 %v4221_v27 }
 0x3bf   :  { %3069 = vmatprep.subr.bf16.mxu0 %v3787_v0  ;;  %3089 = vmatprep.subr.bf16.mxu1 %v3787_v0 }
 0x3c2   :  { %3070 = vmatpush3.bf16.msra.mxu0 %v4226_v28  ;;  %3090 = vmatpush3.bf16.msra.mxu1 %v4229_v29 }
 0x3c3   :  { %3071 = vmatprep.subr.bf16.mxu0 %v3787_v0  ;;  %3091 = vmatprep.subr.bf16.mxu1 %v3787_v0 }
 0x3c6   :  { %3072 = vmatpush3.bf16.msra.mxu0 %v4234_v30  ;;  %3092 = vmatpush3.bf16.msra.mxu1 %v4237_v31 }
 0x3c7   :  { %3073 = vmatprep.subr.bf16.mxu0 %v3787_v0  ;;  %3093 = vmatprep.subr.bf16.mxu1 %v3787_v0 }
 0x3ca   :  { %3074 = vmatpush3.bf16.msra.mxu0 %v4242_v32  ;;  %3094 = vmatpush3.bf16.msra.mxu1 %v4245_v33 }
 0x3cb   :  { %3075 = vmatprep.subr.bf16.mxu0 %v3787_v0  ;;  %3095 = vmatprep.subr.bf16.mxu1 %v3787_v0 }
 0x3ce   :  { %3076 = vmatpush3.bf16.msra.mxu0 %v4250_v56  ;;  %3096 = vmatpush3.bf16.msra.mxu1 %v4253_v61 }
 0x3cf   :  { %3077 = vmatprep.subr.bf16.mxu0 %v3787_v0  ;;  %3097 = vmatprep.subr.bf16.mxu1 %v3787_v0 }
 0x3d2   :  { %3078 = vmatpush3.bf16.msra.mxu0 %v4258_v57  ;;  %3098 = vmatpush3.bf16.msra.mxu1 %v4261_v49 }
 0x3d3   :  { %3103 = vmatprep.subr.bf16.mxu0 %v3787_v0  ;;  %3123 = vmatprep.subr.bf16.mxu1 %v3787_v0 }
 0x455   :  { %v1115_v60 = vpop.f32.mrf.mxu0  ;;  %v1168_v59 = vpop.f32.mrf.mxu1 }
 0x456   :  { %v1175_v47 = vadd.f32 %v1168_v59, %v1132_v41  ;;  %v1122_v59 = vadd.f32 %v1115_v60, %v1079_v46  ;;  %v4297_v46 = vld [vmem:[#allocation7 + $0x8c] ss:$16 sps:$4 sm:$0xff]  }
 0x457   :  { %v3001_v42 = vpop.f32.mrf.mxu0  ;;  %v3021_v58 = vpop.f32.mrf.mxu1 }
 0x458   :  { %v2425_v2 = vmul.f32 -1.442695, %v1175_v47 }
 0x459   :  { %v1118_v44 = vpop.f32.mrf.mxu0  ;;  %v1171_v62 = vpop.f32.mrf.mxu1 }
 0x45a   :  { %v1176_v3 = vadd.f32 %v1171_v62, %v1133_v37  ;;  %3521 = vpow2.f32 %v2425_v2 }
 0x45b   :  { %v3002_v63 = vpop.f32.mrf.mxu0  ;;  %v3022_v19 = vpop.f32.mrf.mxu1 }
 0x45c   :  { %v2426_v7 = vmul.f32 -1.442695, %v1176_v3  ;;  %v1080_v63 = vunpack.c.l.bf16 %v1077_v38 }
 0x45e   :  { %3523 = vpow2.f32 %v2426_v7  ;;  %v1123_v37 = vadd.f32 %v1118_v44, %v1080_v63  ;;  %v4329_v63 = vld [vmem:[#allocation7 + $0xc] ss:$16 sps:$4 sm:$0xff]  }
 0x467   :  { %v3522_v52 = vpop.eup %3521 }
 0x468   :  { %v1183_v58 = vadd.f32 1.0, %v3522_v52  ;;  %v4305_v52 = vld [vmem:[#allocation7 + $0x6c] ss:$16 sps:$4 sm:$0xff]  }
 0x46b   :  { %v3524_v62 = vpop.eup %3523 }
 0x46c   :  { %v1184_v40 = vadd.f32 1.0, %v3524_v62  ;;  %v4326_v62 = vld [vmem:[#allocation7 + $0x8] ss:$16 sps:$4 sm:$0xff]  }
 0x475   :  { %v1225_v1 = vpop.f32.mrf.mxu0  ;;  %v1288_v8 = vpop.f32.mrf.mxu1 }
 0x476   :  { %v1232_v10 = vadd.f32 %v1225_v1, %v1189_v6  ;;  %v1295_v54 = vadd.f32 %v1288_v8, %v1252_v51  ;;  %v4294_v51 = vld [vmem:[#allocation7 + $0x88] ss:$16 sps:$4 sm:$0xff]  }
 0x477   :  { %v3041_v12 = vpop.f32.mrf.mxu0  ;;  %v3061_v13 = vpop.f32.mrf.mxu1 }
 0x478   :  { %v2427_v14 = vmul.f32 -1.442695, %v1232_v10  ;;  %v2429_v19 = vmul.f32 -1.442695, %v1295_v54  ;;  %v4310_v54 = vld [vmem:[#allocation7 + $0x48] ss:$16 sps:$4 sm:$0xff]  }
 0x479   :  { %v1228_v16 = vpop.f32.mrf.mxu0  ;;  %v1291_v17 = vpop.f32.mrf.mxu1 }
 0x47a   :  { %3525 = vpow2.f32 %v2427_v14  ;;  %v1233_v18 = vadd.f32 %v1228_v16, %v1190_v11  ;;  %v1296_v42 = vadd.f32 %v1291_v17, %v1253_v48  ;;  %v4302_v48 = vld [vmem:[#allocation7 + $0x68] ss:$16 sps:$4 sm:$0xff]  }
 0x47b   :  { %v3042_v21 = vpop.f32.mrf.mxu0  ;;  %v3062_v50 = vpop.f32.mrf.mxu1 }
 0x47c   :  { %v2428_v53 = vmul.f32 -1.442695, %v1233_v18  ;;  %v2430_v41 = vmul.f32 -1.442695, %v1296_v42  ;;  %v4318_v42 = vld [vmem:[#allocation7 + $0x28] ss:$16 sps:$4 sm:$0xff]  }
 0x47e   :  { %3527 = vpow2.f32 %v2428_v53  ;;  %v4289_v53 = vld [vmem:[#allocation7 + $0xac] ss:$16 sps:$4 sm:$0xff]  }
 0x47f   :  { %3529 = vtanh.f32 %v1122_v59  ;;  %v4313_v59 = vld [vmem:[#allocation7 + $0x4c] ss:$16 sps:$4 sm:$0xff]  }
 0x480   :  { %3531 = vrcp.f32 %v1183_v58  ;;  %v4321_v58 = vld [vmem:[#allocation7 + $0x2c] ss:$16 sps:$4 sm:$0xff]  }
 0x481   :  { %3533 = vpow2.f32 %v2429_v19 }
 0x487   :  { %v3526_v39 = vpop.eup %3525 }
 0x488   :  { %v1240_v47 = vadd.f32 1.0, %v3526_v39 }
 0x48a   :  { %3535 = vrcp.f32 %v1240_v47 }
 0x48b   :  { %v3528_v2 = vpop.eup %3527  ;;  %3537 = vpow2.f32 %v2430_v41 }
 0x48c   :  { %3539 = vrcp.f32 %v1184_v40  ;;  %v1241_v36 = vadd.f32 1.0, %v3528_v2  ;;  %v3530_v60 = vpop.eup %3529 }
 0x48d   :  { %3541 = vtanh.f32 %v1123_v37  ;;  %v3532_v3 = vpop.eup %3531 }
 0x48e   :  { %3543 = vrcp.f32 %v1241_v36  ;;  %v3534_v4 = vpop.eup %3533  ;;  %v1309_v7 = vmul.f32 %v3532_v3, %v3530_v60  ;;  %v1330_v60 = vld [vmem:[#allocation4 + $0x80] sm:$0xff] }
 0x48f   :  { %v1303_v9 = vadd.f32 1.0, %v3534_v4  ;;  %v1383_v3 = vrot.slane %v1330_v60, 4  ;;  %v1332_v4 = vld [vmem:[#allocation4 + $0x90] sm:$0xff] }
 0x491   :  { %3545 = vrcp.f32 %v1303_v9 }
 0x497   :  { %v3536_v38 = vpop.eup %3535 }
 0x498   :  { %v3538_v6 = vpop.eup %3537  ;;  %v1311_v1 = vmul.f32 %v3536_v38, %v4147_v5  ;;  %v1387_v38 = vunpack.c.l.bf16 %v1383_v3 }
 0x499   :  { %v3540_v8 = vpop.eup %3539  ;;  %v1304_v12 = vadd.f32 1.0, %v3538_v6  ;;  %v1384_v6 = vrot.slane %v1332_v4, 4 }
 0x49a   :  { %v3542_v10 = vpop.eup %3541  ;;  %v4267_v44 = vadd.f32 %v1311_v1, %v1309_v7 }
 0x49b   :  { %v3544_v11 = vpop.eup %3543  ;;  %v1310_v13 = vmul.f32 %v3542_v10, %v3540_v8  ;;  %v1388_v1 = vunpack.c.l.bf16 %v1384_v6  ;;  %v1331_v10 = vld [vmem:[#allocation4 + $0x88] sm:$0xff]  ;;  %v1334_v6 = vunpack.c.l.bf16 %v1330_v60 }
 0x49c   :  { %v1312_v14 = vmul.f32 %v3544_v11, %v4150_v45  ;;  %3547 = vtanh.f32 %v4267_v44  ;;  %v4286_v45 = vld [vmem:[#allocation7 + $0xa8] ss:$16 sps:$4 sm:$0xff]   ;;  %v1444_v11 = vunpack.c.l.bf16 %v1331_v10 }
 0x49d   :  { %3549 = vrcp.f32 %v1304_v12 }
 0x49e   :  { %v4270_v15 = vadd.f32 %v1312_v14, %v1310_v13  ;;  %v3546_v16 = vpop.eup %3545 }
 0x4a0   :  { %3551 = vtanh.f32 %v4270_v15 }
 0x4a9   :  { %v3548_v5 = vpop.eup %3547 }
 0x4aa   :  { %v3550_v17 = vpop.eup %3549  ;;  %v1317_v20 = vmul.f32 %v3548_v5, %v3546_v16  ;;  %v1333_v16 = vld [vmem:[#allocation4 + $0x98] sm:$0xff] }
 0x4ad   :  { %v3552_v18 = vpop.eup %3551 }
 0x4ae   :  { %v1318_v21 = vmul.f32 %v3552_v18, %v3550_v17  ;;  %v1445_v17 = vunpack.c.l.bf16 %v1333_v16 }
 0x4b0   :  { %v1328_v50 = vpack.c.bf16 %v1318_v21, %v1317_v20 }
 0x4b2   :  { %3080 = vmatmul.mubr.bf16.vlgmr.msra.gmra.mxu0 %v1328_v50  ;;  %3100 = vmatmul.mubr.bf16.vlgmr.msra.gmra.mxu1 %v1328_v50 }
 0x4b3   :  { %3104 = vmatpush3.bf16.msra.mxu0 %v4154_v34  ;;  %3124 = vmatpush3.bf16.msra.mxu1 %v4157_v35 }
 0x4b4   :  { %3105 = vmatprep.subr.bf16.mxu0 %v3787_v0  ;;  %3125 = vmatprep.subr.bf16.mxu1 %v3787_v0 }
 0x4b5   :  { %3119 = vmatprep.mubr.msk.bf16.mxu0 %vm3788_vm0, %v3787_v0  ;;  %3139 = vmatprep.mubr.msk.bf16.mxu1 %vm3788_vm0, %v3787_v0 }
 0x4b7   :  { %3106 = vmatpush3.bf16.msra.mxu0 %v4166_v55  ;;  %3126 = vmatpush3.bf16.msra.mxu1 %v4169_v43 }
 0x4b8   :  { %3107 = vmatprep.subr.bf16.mxu0 %v3787_v0  ;;  %3127 = vmatprep.subr.bf16.mxu1 %v3787_v0 }
 0x4bb   :  { %3108 = vmatpush3.bf16.msra.mxu0 %v4286_v45  ;;  %3128 = vmatpush3.bf16.msra.mxu1 %v4289_v53 }
 0x4bc   :  { %3109 = vmatprep.subr.bf16.mxu0 %v3787_v0  ;;  %3129 = vmatprep.subr.bf16.mxu1 %v3787_v0 }
 0x4bf   :  { %3110 = vmatpush3.bf16.msra.mxu0 %v4294_v51  ;;  %3130 = vmatpush3.bf16.msra.mxu1 %v4297_v46 }
 0x4c0   :  { %3111 = vmatprep.subr.bf16.mxu0 %v3787_v0  ;;  %3131 = vmatprep.subr.bf16.mxu1 %v3787_v0 }
 0x4c3   :  { %3112 = vmatpush3.bf16.msra.mxu0 %v4302_v48  ;;  %3132 = vmatpush3.bf16.msra.mxu1 %v4305_v52 }
 0x4c4   :  { %3113 = vmatprep.subr.bf16.mxu0 %v3787_v0  ;;  %3133 = vmatprep.subr.bf16.mxu1 %v3787_v0 }
 0x4c7   :  { %3114 = vmatpush3.bf16.msra.mxu0 %v4310_v54  ;;  %3134 = vmatpush3.bf16.msra.mxu1 %v4313_v59 }
 0x4c8   :  { %3115 = vmatprep.subr.bf16.mxu0 %v3787_v0  ;;  %3135 = vmatprep.subr.bf16.mxu1 %v3787_v0 }
 0x4cb   :  { %3116 = vmatpush3.bf16.msra.mxu0 %v4318_v42  ;;  %3136 = vmatpush3.bf16.msra.mxu1 %v4321_v58 }
 0x4cc   :  { %3117 = vmatprep.subr.bf16.mxu0 %v3787_v0  ;;  %3137 = vmatprep.subr.bf16.mxu1 %v3787_v0 }
 0x4cf   :  { %3118 = vmatpush3.bf16.msra.mxu0 %v4326_v62  ;;  %3138 = vmatpush3.bf16.msra.mxu1 %v4329_v63 }
 0x4d0   :  { %3143 = vmatprep.subr.bf16.mxu0 %v3787_v0  ;;  %3163 = vmatprep.subr.bf16.mxu1 %v3787_v0 }
 0x4d2   :  { %3120 = vmatmul.mubr.bf16.vlgmr.msra.gmra.mxu0 %v1328_v50  ;;  %3140 = vmatmul.mubr.bf16.vlgmr.msra.gmra.mxu1 %v1328_v50  ;;  %v1503_v50 = vrot.slane %v1331_v10, 4 }
 0x4d3   :  { %3144 = vmatpush3.bf16.msra.mxu0 %v4198_v22  ;;  %3164 = vmatpush3.bf16.msra.mxu1 %v4201_v23 }
 0x4d4   :  { %3145 = vmatprep.subr.bf16.mxu0 %v3787_v0  ;;  %3165 = vmatprep.subr.bf16.mxu1 %v3787_v0 }
 0x4d5   :  { %3159 = vmatprep.mubr.msk.bf16.mxu0 %vm3788_vm0, %v3787_v0  ;;  %3179 = vmatprep.mubr.msk.bf16.mxu1 %vm3788_vm0, %v3787_v0 }
 0x4d7   :  { %3146 = vmatpush3.bf16.msra.mxu0 %v4210_v24  ;;  %3166 = vmatpush3.bf16.msra.mxu1 %v4213_v25 }
 0x4d8   :  { %3147 = vmatprep.subr.bf16.mxu0 %v3787_v0  ;;  %3167 = vmatprep.subr.bf16.mxu1 %v3787_v0 }
 0x4db   :  { %3148 = vmatpush3.bf16.msra.mxu0 %v4218_v26  ;;  %3168 = vmatpush3.bf16.msra.mxu1 %v4221_v27 }
 0x4dc   :  { %3149 = vmatprep.subr.bf16.mxu0 %v3787_v0  ;;  %3169 = vmatprep.subr.bf16.mxu1 %v3787_v0 }
 0x4df   :  { %3150 = vmatpush3.bf16.msra.mxu0 %v4226_v28  ;;  %3170 = vmatpush3.bf16.msra.mxu1 %v4229_v29 }
 0x4e0   :  { %3151 = vmatprep.subr.bf16.mxu0 %v3787_v0  ;;  %3171 = vmatprep.subr.bf16.mxu1 %v3787_v0 }
 0x4e3   :  { %3152 = vmatpush3.bf16.msra.mxu0 %v4234_v30  ;;  %3172 = vmatpush3.bf16.msra.mxu1 %v4237_v31 }
 0x4e4   :  { %3153 = vmatprep.subr.bf16.mxu0 %v3787_v0  ;;  %3173 = vmatprep.subr.bf16.mxu1 %v3787_v0 }
 0x4e7   :  { %3154 = vmatpush3.bf16.msra.mxu0 %v4242_v32  ;;  %3174 = vmatpush3.bf16.msra.mxu1 %v4245_v33 }
 0x4e8   :  { %3155 = vmatprep.subr.bf16.mxu0 %v3787_v0  ;;  %3175 = vmatprep.subr.bf16.mxu1 %v3787_v0 }
 0x4eb   :  { %3156 = vmatpush3.bf16.msra.mxu0 %v4250_v56  ;;  %3176 = vmatpush3.bf16.msra.mxu1 %v4253_v61 }
 0x4ec   :  { %3157 = vmatprep.subr.bf16.mxu0 %v3787_v0  ;;  %3177 = vmatprep.subr.bf16.mxu1 %v3787_v0 }
 0x4ef   :  { %3158 = vmatpush3.bf16.msra.mxu0 %v4258_v57  ;;  %3178 = vmatpush3.bf16.msra.mxu1 %v4261_v49 }
 0x4f0   :  { %3183 = vmatprep.subr.bf16.mxu0 %v3787_v0  ;;  %3203 = vmatprep.subr.bf16.mxu1 %v3787_v0 }
 0x572   :  { %v1370_v19 = vpop.f32.mrf.mxu0  ;;  %v1423_v39 = vpop.f32.mrf.mxu1 }
 0x573   :  { %v1430_v7 = vadd.f32 %v1423_v39, %v1387_v38  ;;  %v1507_v38 = vunpack.c.l.bf16 %v1503_v50 }
 0x574   :  { %v3081_v41 = vpop.f32.mrf.mxu0  ;;  %v3101_v40 = vpop.f32.mrf.mxu1 }
 0x575   :  { %v2431_v8 = vmul.f32 -1.442695, %v1430_v7 }
 0x576   :  { %v1373_v47 = vpop.f32.mrf.mxu0  ;;  %v1426_v37 = vpop.f32.mrf.mxu1 }
 0x577   :  { %v1431_v9 = vadd.f32 %v1426_v37, %v1388_v1  ;;  %3553 = vpow2.f32 %v2431_v8 }
 0x578   :  { %v3082_v2 = vpop.f32.mrf.mxu0  ;;  %v3102_v36 = vpop.f32.mrf.mxu1 }
 0x579   :  { %v2432_v12 = vmul.f32 -1.442695, %v1431_v9  ;;  %v1504_v2 = vrot.slane %v1333_v16, 4  ;;  %v1377_v9 = vadd.f32 %v1370_v19, %v1334_v6 }
 0x57b   :  { %3555 = vpow2.f32 %v2432_v12  ;;  %v1508_v7 = vunpack.c.l.bf16 %v1504_v2 }
 0x584   :  { %v3554_v1 = vpop.eup %3553 }
 0x588   :  { %v3556_v12 = vpop.eup %3555 }
 0x589   :  { %v1439_v16 = vadd.f32 1.0, %v3556_v12 }
 0x592   :  { %v1480_v13 = vpop.f32.mrf.mxu0  ;;  %v1543_v14 = vpop.f32.mrf.mxu1 }
 0x593   :  { %v1487_v5 = vadd.f32 %v1480_v13, %v1444_v11  ;;  %v1550_v8 = vadd.f32 %v1543_v14, %v1507_v38  ;;  %v1438_v13 = vadd.f32 1.0, %v3554_v1 }
 0x594   :  { %v3121_v18 = vpop.f32.mrf.mxu0  ;;  %v3141_v20 = vpop.f32.mrf.mxu1 }
 0x595   :  { %v2433_v21 = vmul.f32 -1.442695, %v1487_v5  ;;  %v1335_v5 = vunpack.c.l.bf16 %v1332_v4  ;;  %v2435_v10 = vmul.f32 -1.442695, %v1550_v8 }
 0x596   :  { %v1483_v41 = vpop.f32.mrf.mxu0  ;;  %v1546_v40 = vpop.f32.mrf.mxu1 }
 0x597   :  { %3557 = vpow2.f32 %v2433_v21  ;;  %v1488_v39 = vadd.f32 %v1483_v41, %v1445_v17  ;;  %v1551_v11 = vadd.f32 %v1546_v40, %v1508_v7  ;;  %v1378_v21 = vadd.f32 %v1373_v47, %v1335_v5 }
 0x598   :  { %v3122_v37 = vpop.f32.mrf.mxu0  ;;  %v3142_v36 = vpop.f32.mrf.mxu1 }
 0x599   :  { %v2434_v3 = vmul.f32 -1.442695, %v1488_v39  ;;  %v2436_v20 = vmul.f32 -1.442695, %v1551_v11 }
 0x59b   :  { %3559 = vpow2.f32 %v2434_v3 }
 0x59c   :  { %3561 = vtanh.f32 %v1377_v9 }
 0x59d   :  { %3563 = vrcp.f32 %v1438_v13 }
 0x59e   :  { %3565 = vpow2.f32 %v2435_v10 }
 0x5a4   :  { %v3558_v18 = vpop.eup %3557 }
 0x5a5   :  { %v1495_v17 = vadd.f32 1.0, %v3558_v18 }
 0x5a7   :  { %3567 = vrcp.f32 %v1495_v17 }
 0x5a8   :  { %v3560_v50 = vpop.eup %3559  ;;  %3569 = vpow2.f32 %v2436_v20 }
 0x5a9   :  { %3571 = vrcp.f32 %v1439_v16  ;;  %v1496_v60 = vadd.f32 1.0, %v3560_v50  ;;  %v3562_v19 = vpop.eup %3561 }
 0x5aa   :  { %3573 = vtanh.f32 %v1378_v21  ;;  %v3564_v14 = vpop.eup %3563 }
 0x5ab   :  { %3575 = vrcp.f32 %v1496_v60  ;;  %v3566_v41 = vpop.eup %3565  ;;  %v1564_v39 = vmul.f32 %v3564_v14, %v3562_v19  ;;  %v1585_v19 = vld [vmem:[#allocation4 + $0xa0] sm:$0xff] }
 0x5ac   :  { %v1558_v36 = vadd.f32 1.0, %v3566_v41  ;;  %v1638_v14 = vrot.slane %v1585_v19, 4  ;;  %v1587_v41 = vld [vmem:[#allocation4 + $0xb0] sm:$0xff] }
 0x5ae   :  { %3577 = vrcp.f32 %v1558_v36 }
 0x5b4   :  { %v3568_v4 = vpop.eup %3567 }
 0x5b5   :  { %v3570_v40 = vpop.eup %3569  ;;  %v1566_v2 = vmul.f32 %v3568_v4, %v4267_v44  ;;  %v1642_v4 = vunpack.c.l.bf16 %v1638_v14 }
 0x5b6   :  { %v3572_v37 = vpop.eup %3571  ;;  %v1559_v6 = vadd.f32 1.0, %v3570_v40  ;;  %v1639_v40 = vrot.slane %v1587_v41, 4 }
 0x5b7   :  { %v3574_v3 = vpop.eup %3573  ;;  %v4371_v47 = vadd.f32 %v1566_v2, %v1564_v39 }
 0x5b8   :  { %v3576_v38 = vpop.eup %3575  ;;  %v1565_v7 = vmul.f32 %v3574_v3, %v3572_v37  ;;  %v1643_v2 = vunpack.c.l.bf16 %v1639_v40  ;;  %v1586_v3 = vld [vmem:[#allocation4 + $0xa8] sm:$0xff]  ;;  %v1589_v40 = vunpack.c.l.bf16 %v1585_v19 }
 0x5b9   :  { %v1567_v1 = vmul.f32 %v3576_v38, %v4270_v15  ;;  %3579 = vtanh.f32 %v4371_v47  ;;  %v1699_v38 = vunpack.c.l.bf16 %v1586_v3 }
 0x5ba   :  { %3581 = vrcp.f32 %v1559_v6 }
 0x5bb   :  { %v4374_v8 = vadd.f32 %v1567_v1, %v1565_v7  ;;  %v3578_v9 = vpop.eup %3577 }
 0x5bd   :  { %3583 = vtanh.f32 %v4374_v8 }
 0x5c6   :  { %v3580_v44 = vpop.eup %3579 }
 0x5c7   :  { %v3582_v11 = vpop.eup %3581  ;;  %v1572_v12 = vmul.f32 %v3580_v44, %v3578_v9  ;;  %v1588_v9 = vld [vmem:[#allocation4 + $0xb8] sm:$0xff] }
 0x5ca   :  { %v3584_v13 = vpop.eup %3583 }
 0x5cb   :  { %v1573_v5 = vmul.f32 %v3584_v13, %v3582_v11  ;;  %v1700_v11 = vunpack.c.l.bf16 %v1588_v9 }
 0x5cd   :  { %v1583_v10 = vpack.c.bf16 %v1573_v5, %v1572_v12 }
 0x5cf   :  { %3160 = vmatmul.mubr.bf16.vlgmr.msra.gmra.mxu0 %v1583_v10  ;;  %3180 = vmatmul.mubr.bf16.vlgmr.msra.gmra.mxu1 %v1583_v10 }
 0x5d0   :  { %3184 = vmatpush3.bf16.msra.mxu0 %v4154_v34  ;;  %3204 = vmatpush3.bf16.msra.mxu1 %v4157_v35 }
 0x5d1   :  { %3185 = vmatprep.subr.bf16.mxu0 %v3787_v0  ;;  %3205 = vmatprep.subr.bf16.mxu1 %v3787_v0 }
 0x5d2   :  { %3199 = vmatprep.mubr.msk.bf16.mxu0 %vm3788_vm0, %v3787_v0  ;;  %3219 = vmatprep.mubr.msk.bf16.mxu1 %vm3788_vm0, %v3787_v0 }
 0x5d4   :  { %3186 = vmatpush3.bf16.msra.mxu0 %v4166_v55  ;;  %3206 = vmatpush3.bf16.msra.mxu1 %v4169_v43 }
 0x5d5   :  { %3187 = vmatprep.subr.bf16.mxu0 %v3787_v0  ;;  %3207 = vmatprep.subr.bf16.mxu1 %v3787_v0 }
 0x5d8   :  { %3188 = vmatpush3.bf16.msra.mxu0 %v4286_v45  ;;  %3208 = vmatpush3.bf16.msra.mxu1 %v4289_v53 }
 0x5d9   :  { %3189 = vmatprep.subr.bf16.mxu0 %v3787_v0  ;;  %3209 = vmatprep.subr.bf16.mxu1 %v3787_v0 }
 0x5dc   :  { %3190 = vmatpush3.bf16.msra.mxu0 %v4294_v51  ;;  %3210 = vmatpush3.bf16.msra.mxu1 %v4297_v46 }
 0x5dd   :  { %3191 = vmatprep.subr.bf16.mxu0 %v3787_v0  ;;  %3211 = vmatprep.subr.bf16.mxu1 %v3787_v0 }
 0x5e0   :  { %3192 = vmatpush3.bf16.msra.mxu0 %v4302_v48  ;;  %3212 = vmatpush3.bf16.msra.mxu1 %v4305_v52 }
 0x5e1   :  { %3193 = vmatprep.subr.bf16.mxu0 %v3787_v0  ;;  %3213 = vmatprep.subr.bf16.mxu1 %v3787_v0 }
 0x5e4   :  { %3194 = vmatpush3.bf16.msra.mxu0 %v4310_v54  ;;  %3214 = vmatpush3.bf16.msra.mxu1 %v4313_v59 }
 0x5e5   :  { %3195 = vmatprep.subr.bf16.mxu0 %v3787_v0  ;;  %3215 = vmatprep.subr.bf16.mxu1 %v3787_v0 }
 0x5e8   :  { %3196 = vmatpush3.bf16.msra.mxu0 %v4318_v42  ;;  %3216 = vmatpush3.bf16.msra.mxu1 %v4321_v58 }
 0x5e9   :  { %3197 = vmatprep.subr.bf16.mxu0 %v3787_v0  ;;  %3217 = vmatprep.subr.bf16.mxu1 %v3787_v0 }
 0x5ec   :  { %3198 = vmatpush3.bf16.msra.mxu0 %v4326_v62  ;;  %3218 = vmatpush3.bf16.msra.mxu1 %v4329_v63 }
 0x5ed   :  { %3223 = vmatprep.subr.bf16.mxu0 %v3787_v0  ;;  %3243 = vmatprep.subr.bf16.mxu1 %v3787_v0 }
 0x5ef   :  { %3200 = vmatmul.mubr.bf16.vlgmr.msra.gmra.mxu0 %v1583_v10  ;;  %3220 = vmatmul.mubr.bf16.vlgmr.msra.gmra.mxu1 %v1583_v10  ;;  %v1758_v10 = vrot.slane %v1586_v3, 4 }
 0x5f0   :  { %3224 = vmatpush3.bf16.msra.mxu0 %v4198_v22  ;;  %3244 = vmatpush3.bf16.msra.mxu1 %v4201_v23 }
 0x5f1   :  { %3225 = vmatprep.subr.bf16.mxu0 %v3787_v0  ;;  %3245 = vmatprep.subr.bf16.mxu1 %v3787_v0 }
 0x5f2   :  { %3239 = vmatprep.mubr.msk.bf16.mxu0 %vm3788_vm0, %v3787_v0  ;;  %3259 = vmatprep.mubr.msk.bf16.mxu1 %vm3788_vm0, %v3787_v0 }
 0x5f4   :  { %3226 = vmatpush3.bf16.msra.mxu0 %v4210_v24  ;;  %3246 = vmatpush3.bf16.msra.mxu1 %v4213_v25 }
 0x5f5   :  { %3227 = vmatprep.subr.bf16.mxu0 %v3787_v0  ;;  %3247 = vmatprep.subr.bf16.mxu1 %v3787_v0 }
 0x5f8   :  { %3228 = vmatpush3.bf16.msra.mxu0 %v4218_v26  ;;  %3248 = vmatpush3.bf16.msra.mxu1 %v4221_v27 }
 0x5f9   :  { %3229 = vmatprep.subr.bf16.mxu0 %v3787_v0  ;;  %3249 = vmatprep.subr.bf16.mxu1 %v3787_v0 }
 0x5fc   :  { %3230 = vmatpush3.bf16.msra.mxu0 %v4226_v28  ;;  %3250 = vmatpush3.bf16.msra.mxu1 %v4229_v29 }
 0x5fd   :  { %3231 = vmatprep.subr.bf16.mxu0 %v3787_v0  ;;  %3251 = vmatprep.subr.bf16.mxu1 %v3787_v0 }
 0x600   :  { %3232 = vmatpush3.bf16.msra.mxu0 %v4234_v30  ;;  %3252 = vmatpush3.bf16.msra.mxu1 %v4237_v31 }
 0x601   :  { %3233 = vmatprep.subr.bf16.mxu0 %v3787_v0  ;;  %3253 = vmatprep.subr.bf16.mxu1 %v3787_v0 }
 0x604   :  { %3234 = vmatpush3.bf16.msra.mxu0 %v4242_v32  ;;  %3254 = vmatpush3.bf16.msra.mxu1 %v4245_v33 }
 0x605   :  { %3235 = vmatprep.subr.bf16.mxu0 %v3787_v0  ;;  %3255 = vmatprep.subr.bf16.mxu1 %v3787_v0 }
 0x608   :  { %3236 = vmatpush3.bf16.msra.mxu0 %v4250_v56  ;;  %3256 = vmatpush3.bf16.msra.mxu1 %v4253_v61 }
 0x609   :  { %3237 = vmatprep.subr.bf16.mxu0 %v3787_v0  ;;  %3257 = vmatprep.subr.bf16.mxu1 %v3787_v0 }
 0x60c   :  { %3238 = vmatpush3.bf16.msra.mxu0 %v4258_v57  ;;  %3258 = vmatpush3.bf16.msra.mxu1 %v4261_v49 }
 0x60d   :  { %3263 = vmatprep.subr.bf16.mxu0 %v3787_v0  ;;  %3283 = vmatprep.subr.bf16.mxu1 %v3787_v0 }
 0x68f   :  { %v1625_v15 = vpop.f32.mrf.mxu0  ;;  %v1678_v18 = vpop.f32.mrf.mxu1 }
 0x690   :  { %v1685_v39 = vadd.f32 %v1678_v18, %v1642_v4  ;;  %v1762_v4 = vunpack.c.l.bf16 %v1758_v10 }
 0x691   :  { %v3161_v20 = vpop.f32.mrf.mxu0  ;;  %v3181_v16 = vpop.f32.mrf.mxu1 }
 0x692   :  { %v2437_v37 = vmul.f32 -1.442695, %v1685_v39 }
 0x693   :  { %v1628_v17 = vpop.f32.mrf.mxu0  ;;  %v1681_v21 = vpop.f32.mrf.mxu1 }
 0x694   :  { %v1686_v36 = vadd.f32 %v1681_v21, %v1643_v2  ;;  %3585 = vpow2.f32 %v2437_v37 }
 0x695   :  { %v3162_v50 = vpop.f32.mrf.mxu0  ;;  %v3182_v60 = vpop.f32.mrf.mxu1 }
 0x696   :  { %v2438_v6 = vmul.f32 -1.442695, %v1686_v36  ;;  %v1759_v50 = vrot.slane %v1588_v9, 4  ;;  %v1632_v36 = vadd.f32 %v1625_v15, %v1589_v40 }
 0x698   :  { %3587 = vpow2.f32 %v2438_v6  ;;  %v1763_v39 = vunpack.c.l.bf16 %v1759_v50 }
 0x6a1   :  { %v3586_v2 = vpop.eup %3585 }
 0x6a5   :  { %v3588_v6 = vpop.eup %3587 }
 0x6a6   :  { %v1694_v9 = vadd.f32 1.0, %v3588_v6 }
 0x6af   :  { %v1735_v7 = vpop.f32.mrf.mxu0  ;;  %v1798_v1 = vpop.f32.mrf.mxu1 }
 0x6b0   :  { %v1742_v44 = vadd.f32 %v1735_v7, %v1699_v38  ;;  %v1805_v37 = vadd.f32 %v1798_v1, %v1762_v4  ;;  %v1693_v7 = vadd.f32 1.0, %v3586_v2 }
 0x6b1   :  { %v3201_v13 = vpop.f32.mrf.mxu0  ;;  %v3221_v12 = vpop.f32.mrf.mxu1 }
 0x6b2   :  { %v2439_v5 = vmul.f32 -1.442695, %v1742_v44  ;;  %v1590_v44 = vunpack.c.l.bf16 %v1587_v41  ;;  %v2441_v3 = vmul.f32 -1.442695, %v1805_v37 }
 0x6b3   :  { %v1738_v20 = vpop.f32.mrf.mxu0  ;;  %v1801_v16 = vpop.f32.mrf.mxu1 }
 0x6b4   :  { %3589 = vpow2.f32 %v2439_v5  ;;  %v1743_v18 = vadd.f32 %v1738_v20, %v1700_v11  ;;  %v1806_v38 = vadd.f32 %v1801_v16, %v1763_v39  ;;  %v1633_v5 = vadd.f32 %v1628_v17, %v1590_v44 }
 0x6b5   :  { %v3202_v21 = vpop.f32.mrf.mxu0  ;;  %v3222_v60 = vpop.f32.mrf.mxu1 }
 0x6b6   :  { %v2440_v14 = vmul.f32 -1.442695, %v1743_v18  ;;  %v2442_v12 = vmul.f32 -1.442695, %v1806_v38 }
 0x6b8   :  { %3591 = vpow2.f32 %v2440_v14 }
 0x6b9   :  { %3593 = vtanh.f32 %v1632_v36 }
 0x6ba   :  { %3595 = vrcp.f32 %v1693_v7 }
 0x6bb   :  { %3597 = vpow2.f32 %v2441_v3 }
 0x6c1   :  { %v3590_v13 = vpop.eup %3589 }
 0x6c2   :  { %v1750_v11 = vadd.f32 1.0, %v3590_v13 }
 0x6c4   :  { %3599 = vrcp.f32 %v1750_v11 }
 0x6c5   :  { %v3592_v10 = vpop.eup %3591  ;;  %3601 = vpow2.f32 %v2442_v12  ;;  %v1843_v12 = vld [vmem:[#allocation4 + $0xd8] sm:$0xff] }
 0x6c6   :  { %3603 = vrcp.f32 %v1694_v9  ;;  %v1751_v19 = vadd.f32 1.0, %v3592_v10  ;;  %v3594_v15 = vpop.eup %3593  ;;  %v1955_v11 = vunpack.c.l.bf16 %v1843_v12 }
 0x6c7   :  { %3605 = vtanh.f32 %v1633_v5  ;;  %v3596_v1 = vpop.eup %3595 }
 0x6c8   :  { %3607 = vrcp.f32 %v1751_v19  ;;  %v3598_v20 = vpop.eup %3597  ;;  %v1819_v18 = vmul.f32 %v3596_v1, %v3594_v15 }
 0x6c9   :  { %v1813_v60 = vadd.f32 1.0, %v3598_v20 }
 0x6cb   :  { %3609 = vrcp.f32 %v1813_v60 }
 0x6d1   :  { %v3600_v41 = vpop.eup %3599 }
 0x6d2   :  { %v3602_v16 = vpop.eup %3601  ;;  %v1821_v50 = vmul.f32 %v3600_v41, %v4371_v47 }
 0x6d3   :  { %v3604_v21 = vpop.eup %3603  ;;  %v1814_v40 = vadd.f32 1.0, %v3602_v16  ;;  %v2014_v16 = vrot.slane %v1843_v12, 4 }
 0x6d4   :  { %v3606_v14 = vpop.eup %3605  ;;  %v4451_v17 = vadd.f32 %v1821_v50, %v1819_v18 }
 0x6d5   :  { %v3608_v4 = vpop.eup %3607  ;;  %v1820_v39 = vmul.f32 %v3606_v14, %v3604_v21 }
 0x6d6   :  { %v1822_v2 = vmul.f32 %v3608_v4, %v4374_v8  ;;  %3611 = vtanh.f32 %v4451_v17  ;;  %v2018_v4 = vunpack.c.l.bf16 %v2014_v16 }
 0x6d7   :  { %3613 = vrcp.f32 %v1814_v40 }
 0x6d8   :  { %v4454_v37 = vadd.f32 %v1822_v2, %v1820_v39  ;;  %v3610_v36 = vpop.eup %3609 }
 0x6da   :  { %3615 = vtanh.f32 %v4454_v37 }
 0x6e3   :  { %v3612_v47 = vpop.eup %3611 }
 0x6e4   :  { %v3614_v38 = vpop.eup %3613  ;;  %v1827_v6 = vmul.f32 %v3612_v47, %v3610_v36 }
 0x6e7   :  { %v3616_v7 = vpop.eup %3615 }
 0x6e8   :  { %v1828_v44 = vmul.f32 %v3616_v7, %v3614_v38 }
 0x6ea   :  { %v1838_v3 = vpack.c.bf16 %v1828_v44, %v1827_v6 }
 0x6ec   :  { %3240 = vmatmul.mubr.bf16.vlgmr.msra.gmra.mxu0 %v1838_v3  ;;  %3260 = vmatmul.mubr.bf16.vlgmr.msra.gmra.mxu1 %v1838_v3 }
 0x6ed   :  { %3264 = vmatpush3.bf16.msra.mxu0 %v4154_v34  ;;  %3284 = vmatpush3.bf16.msra.mxu1 %v4157_v35 }
 0x6ee   :  { %3265 = vmatprep.subr.bf16.mxu0 %v3787_v0  ;;  %3285 = vmatprep.subr.bf16.mxu1 %v3787_v0 }
 0x6ef   :  { %3279 = vmatprep.mubr.msk.bf16.mxu0 %vm3788_vm0, %v3787_v0  ;;  %3299 = vmatprep.mubr.msk.bf16.mxu1 %vm3788_vm0, %v3787_v0 }
 0x6f1   :  { %3266 = vmatpush3.bf16.msra.mxu0 %v4166_v55  ;;  %3286 = vmatpush3.bf16.msra.mxu1 %v4169_v43 }
 0x6f2   :  { %3267 = vmatprep.subr.bf16.mxu0 %v3787_v0  ;;  %3287 = vmatprep.subr.bf16.mxu1 %v3787_v0 }
 0x6f5   :  { %3268 = vmatpush3.bf16.msra.mxu0 %v4286_v45  ;;  %3288 = vmatpush3.bf16.msra.mxu1 %v4289_v53 }
 0x6f6   :  { %3269 = vmatprep.subr.bf16.mxu0 %v3787_v0  ;;  %3289 = vmatprep.subr.bf16.mxu1 %v3787_v0 }
 0x6f9   :  { %3270 = vmatpush3.bf16.msra.mxu0 %v4294_v51  ;;  %3290 = vmatpush3.bf16.msra.mxu1 %v4297_v46 }
 0x6fa   :  { %3271 = vmatprep.subr.bf16.mxu0 %v3787_v0  ;;  %3291 = vmatprep.subr.bf16.mxu1 %v3787_v0 }
 0x6fd   :  { %3272 = vmatpush3.bf16.msra.mxu0 %v4302_v48  ;;  %3292 = vmatpush3.bf16.msra.mxu1 %v4305_v52 }
 0x6fe   :  { %3273 = vmatprep.subr.bf16.mxu0 %v3787_v0  ;;  %3293 = vmatprep.subr.bf16.mxu1 %v3787_v0 }
 0x701   :  { %3274 = vmatpush3.bf16.msra.mxu0 %v4310_v54  ;;  %3294 = vmatpush3.bf16.msra.mxu1 %v4313_v59 }
 0x702   :  { %3275 = vmatprep.subr.bf16.mxu0 %v3787_v0  ;;  %3295 = vmatprep.subr.bf16.mxu1 %v3787_v0 }
 0x705   :  { %3276 = vmatpush3.bf16.msra.mxu0 %v4318_v42  ;;  %3296 = vmatpush3.bf16.msra.mxu1 %v4321_v58 }
 0x706   :  { %3277 = vmatprep.subr.bf16.mxu0 %v3787_v0  ;;  %3297 = vmatprep.subr.bf16.mxu1 %v3787_v0 }
 0x709   :  { %3278 = vmatpush3.bf16.msra.mxu0 %v4326_v62  ;;  %3298 = vmatpush3.bf16.msra.mxu1 %v4329_v63 }
 0x70a   :  { %3303 = vmatprep.subr.bf16.mxu0 %v3787_v0  ;;  %3323 = vmatprep.subr.bf16.mxu1 %v3787_v0 }
 0x70c   :  { %3280 = vmatmul.mubr.bf16.vlgmr.msra.gmra.mxu0 %v1838_v3  ;;  %3300 = vmatmul.mubr.bf16.vlgmr.msra.gmra.mxu1 %v1838_v3 }
 0x70d   :  { %3304 = vmatpush3.bf16.msra.mxu0 %v4198_v22  ;;  %3324 = vmatpush3.bf16.msra.mxu1 %v4201_v23 }
 0x70e   :  { %3305 = vmatprep.subr.bf16.mxu0 %v3787_v0  ;;  %3325 = vmatprep.subr.bf16.mxu1 %v3787_v0 }
 0x70f   :  { %3319 = vmatprep.mubr.msk.bf16.mxu0 %vm3788_vm0, %v3787_v0  ;;  %3339 = vmatprep.mubr.msk.bf16.mxu1 %vm3788_vm0, %v3787_v0 }
 0x711   :  { %3306 = vmatpush3.bf16.msra.mxu0 %v4210_v24  ;;  %3326 = vmatpush3.bf16.msra.mxu1 %v4213_v25 }
 0x712   :  { %3307 = vmatprep.subr.bf16.mxu0 %v3787_v0  ;;  %3327 = vmatprep.subr.bf16.mxu1 %v3787_v0 }
 0x715   :  { %3308 = vmatpush3.bf16.msra.mxu0 %v4218_v26  ;;  %3328 = vmatpush3.bf16.msra.mxu1 %v4221_v27  ;;  %v1840_v26 = vld [vmem:[#allocation4 + $0xc0] sm:$0xff] }
 0x716   :  { %3309 = vmatprep.subr.bf16.mxu0 %v3787_v0  ;;  %3329 = vmatprep.subr.bf16.mxu1 %v3787_v0  ;;  %v1893_v27 = vrot.slane %v1840_v26, 4  ;;  %v1844_v14 = vunpack.c.l.bf16 %v1840_v26 }
 0x719   :  { %3310 = vmatpush3.bf16.msra.mxu0 %v4226_v28  ;;  %3330 = vmatpush3.bf16.msra.mxu1 %v4229_v29  ;;  %v1842_v28 = vld [vmem:[#allocation4 + $0xd0] sm:$0xff]  ;;  %v1897_v29 = vunpack.c.l.bf16 %v1893_v27 }
 0x71a   :  { %3311 = vmatprep.subr.bf16.mxu0 %v3787_v0  ;;  %3331 = vmatprep.subr.bf16.mxu1 %v3787_v0  ;;  %v1845_v7 = vunpack.c.l.bf16 %v1842_v28 }
 0x71d   :  { %3312 = vmatpush3.bf16.msra.mxu0 %v4234_v30  ;;  %3332 = vmatpush3.bf16.msra.mxu1 %v4237_v31  ;;  %v1894_v30 = vrot.slane %v1842_v28, 4 }
 0x71e   :  { %3313 = vmatprep.subr.bf16.mxu0 %v3787_v0  ;;  %3333 = vmatprep.subr.bf16.mxu1 %v3787_v0 }
 0x721   :  { %3314 = vmatpush3.bf16.msra.mxu0 %v4242_v32  ;;  %3334 = vmatpush3.bf16.msra.mxu1 %v4245_v33  ;;  %v1898_v32 = vunpack.c.l.bf16 %v1894_v30 }
 0x722   :  { %3315 = vmatprep.subr.bf16.mxu0 %v3787_v0  ;;  %3335 = vmatprep.subr.bf16.mxu1 %v3787_v0 }
 0x725   :  { %3316 = vmatpush3.bf16.msra.mxu0 %v4250_v56  ;;  %3336 = vmatpush3.bf16.msra.mxu1 %v4253_v61  ;;  %v1841_v61 = vld [vmem:[#allocation4 + $0xc8] sm:$0xff] }
 0x726   :  { %3317 = vmatprep.subr.bf16.mxu0 %v3787_v0  ;;  %3337 = vmatprep.subr.bf16.mxu1 %v3787_v0  ;;  %v2013_v15 = vrot.slane %v1841_v61, 4 }
 0x728   :  { %v2017_v60 = vunpack.c.l.bf16 %v2013_v15  ;;  %v3715_v15 = vld [vmem:[#allocation7 + $0xc8] ss:$16 sps:$4 sm:$0xff]  }
 0x729   :  { %3318 = vmatpush3.bf16.msra.mxu0 %v4258_v57  ;;  %3338 = vmatpush3.bf16.msra.mxu1 %v4261_v49  ;;  %v1954_v57 = vunpack.c.l.bf16 %v1841_v61 }
 0x72a   :  { %3343 = vmatprep.subr.bf16.mxu0 %v3787_v0  ;;  %3363 = vmatprep.subr.bf16.mxu1 %v3787_v0 }
 0x7ac   :  { %v1880_v34 = vpop.f32.mrf.mxu0  ;;  %v1933_v35 = vpop.f32.mrf.mxu1 }
 0x7ad   :  { %v1940_v31 = vadd.f32 %v1933_v35, %v1897_v29  ;;  %v1887_v2 = vadd.f32 %v1880_v34, %v1844_v14 }
 0x7ae   :  { %v3241_v55 = vpop.f32.mrf.mxu0  ;;  %v3261_v43 = vpop.f32.mrf.mxu1 }
 0x7af   :  { %v2443_v33 = vmul.f32 -1.442695, %v1940_v31 }
 0x7b0   :  { %v1883_v22 = vpop.f32.mrf.mxu0  ;;  %v1936_v23 = vpop.f32.mrf.mxu1 }
 0x7b1   :  { %v1941_v56 = vadd.f32 %v1936_v23, %v1898_v32  ;;  %3617 = vpow2.f32 %v2443_v33  ;;  %v1888_v43 = vadd.f32 %v1883_v22, %v1845_v7 }
 0x7b2   :  { %v3242_v24 = vpop.f32.mrf.mxu0  ;;  %v3262_v25 = vpop.f32.mrf.mxu1 }
 0x7b3   :  { %v2444_v49 = vmul.f32 -1.442695, %v1941_v56 }
 0x7b5   :  { %3619 = vpow2.f32 %v2444_v49 }
 0x7be   :  { %v3618_v40 = vpop.eup %3617 }
 0x7bf   :  { %v1948_v47 = vadd.f32 1.0, %v3618_v40  ;;  %v2098_v40 = vld [vmem:[#allocation4 + $0xf8] sm:$0xff] }
 0x7c2   :  { %v3620_v38 = vpop.eup %3619 }
 0x7c3   :  { %v1949_v35 = vadd.f32 1.0, %v3620_v38 }
 0x7cc   :  { %v1990_v8 = vpop.f32.mrf.mxu0  ;;  %v2053_v13 = vpop.f32.mrf.mxu1 }
 0x7cd   :  { %v1997_v9 = vadd.f32 %v1990_v8, %v1954_v57  ;;  %v2060_v39 = vadd.f32 %v2053_v13, %v2017_v60 }
 0x7ce   :  { %v3281_v5 = vpop.f32.mrf.mxu0  ;;  %v3301_v10 = vpop.f32.mrf.mxu1 }
 0x7cf   :  { %v2445_v19 = vmul.f32 -1.442695, %v1997_v9  ;;  %v2447_v6 = vmul.f32 -1.442695, %v2060_v39 }
 0x7d0   :  { %v1993_v1 = vpop.f32.mrf.mxu0  ;;  %v2056_v20 = vpop.f32.mrf.mxu1 }
 0x7d1   :  { %3621 = vpow2.f32 %v2445_v19  ;;  %v1998_v41 = vadd.f32 %v1993_v1, %v1955_v11  ;;  %v2061_v36 = vadd.f32 %v2056_v20, %v2018_v4  ;;  %v3713_v19 = vld [vmem:[#allocation7 + $0xe8] ss:$16 sps:$4 sm:$0xff]   ;;  %v3716_v1 = vld [vmem:[#allocation7 + $0xcc] ss:$16 sps:$4 sm:$0xff]   ;;  %v2097_v20 = vld [vmem:[#allocation4 + $0xf0] sm:$0xff] }
 0x7d2   :  { %v3282_v18 = vpop.f32.mrf.mxu0  ;;  %v3302_v50 = vpop.f32.mrf.mxu1  ;;  %v2149_v16 = vrot.slane %v2097_v20, 4 }
 0x7d3   :  { %v2446_v21 = vmul.f32 -1.442695, %v1998_v41  ;;  %v2448_v3 = vmul.f32 -1.442695, %v2061_v36 }
 0x7d4   :  { %v2153_v18 = vunpack.c.l.bf16 %v2149_v16 }
 0x7d5   :  { %3623 = vpow2.f32 %v2446_v21 }
 0x7d6   :  { %3625 = vtanh.f32 %v1887_v2  ;;  %v2210_v2 = vunpack.c.l.bf16 %v2098_v40 }
 0x7d7   :  { %3627 = vrcp.f32 %v1948_v47 }
 0x7d8   :  { %3629 = vpow2.f32 %v2447_v6 }
 0x7de   :  { %v3622_v44 = vpop.eup %3621 }
 0x7df   :  { %v2005_v55 = vadd.f32 1.0, %v3622_v44 }
 0x7e1   :  { %3631 = vrcp.f32 %v2005_v55  ;;  %v2269_v55 = vrot.slane %v2098_v40, 4 }
 0x7e2   :  { %v3624_v23 = vpop.eup %3623  ;;  %3633 = vpow2.f32 %v2448_v3 }
 0x7e3   :  { %3635 = vrcp.f32 %v1949_v35  ;;  %v2006_v24 = vadd.f32 1.0, %v3624_v23  ;;  %v3626_v34 = vpop.eup %3625 }
 0x7e4   :  { %3637 = vtanh.f32 %v1888_v43  ;;  %v3628_v25 = vpop.eup %3627 }
 0x7e5   :  { %3639 = vrcp.f32 %v2006_v24  ;;  %v3630_v26 = vpop.eup %3629  ;;  %v2074_v29 = vmul.f32 %v3628_v25, %v3626_v34  ;;  %v2273_v25 = vunpack.c.l.bf16 %v2269_v55 }
 0x7e6   :  { %v2068_v32 = vadd.f32 1.0, %v3630_v26 }
 0x7e8   :  { %3641 = vrcp.f32 %v2068_v32 }
 0x7ee   :  { %v3632_v27 = vpop.eup %3631 }
 0x7ef   :  { %v3634_v28 = vpop.eup %3633  ;;  %v2076_v30 = vmul.f32 %v3632_v27, %v4451_v17 }
 0x7f0   :  { %v3636_v31 = vpop.eup %3635  ;;  %v2069_v61 = vadd.f32 1.0, %v3634_v28 }
 0x7f1   :  { %v3638_v33 = vpop.eup %3637  ;;  %v4531_v22 = vadd.f32 %v2076_v30, %v2074_v29 }
 0x7f2   :  { %v3640_v56 = vpop.eup %3639  ;;  %v2075_v57 = vmul.f32 %v3638_v33, %v3636_v31  ;;  %v2100_v33 = vunpack.c.l.bf16 %v2097_v20 }
 0x7f3   :  { %v2077_v49 = vmul.f32 %v3640_v56, %v4454_v37  ;;  %3643 = vtanh.f32 %v4531_v22  ;;  %v3714_v37 = vld [vmem:[#allocation7 + $0xec] ss:$16 sps:$4 sm:$0xff]  }
 0x7f4   :  { %3645 = vrcp.f32 %v2069_v61 }
 0x7f5   :  { %v4534_v8 = vadd.f32 %v2077_v49, %v2075_v57  ;;  %v3642_v13 = vpop.eup %3641 }
 0x7f7   :  { %3647 = vtanh.f32 %v4534_v8 }
 0x800   :  { %v3644_v17 = vpop.eup %3643 }
 0x801   :  { %v3646_v12 = vpop.eup %3645  ;;  %v2082_v11 = vmul.f32 %v3644_v17, %v3642_v13 }
 0x804   :  { %v3648_v9 = vpop.eup %3647 }
 0x805   :  { %v2083_v5 = vmul.f32 %v3648_v9, %v3646_v12 }
 0x807   :  { %v2093_v10 = vpack.c.bf16 %v2083_v5, %v2082_v11 }
 0x809   :  { %3320 = vmatmul.mubr.bf16.vlgmr.msra.gmra.mxu0 %v2093_v10  ;;  %3340 = vmatmul.mubr.bf16.vlgmr.msra.gmra.mxu1 %v2093_v10 }
 0x80a   :  { %3344 = vmatpush3.bf16.msra.mxu0 %v3713_v19  ;;  %3364 = vmatpush3.bf16.msra.mxu1 %v3714_v37 }
 0x80b   :  { %3345 = vmatprep.subr.bf16.mxu0 %v3787_v0  ;;  %3365 = vmatprep.subr.bf16.mxu1 %v3787_v0 }
 0x80c   :  { %3359 = vmatprep.mubr.msk.bf16.mxu0 %vm3788_vm0, %v3787_v0  ;;  %3379 = vmatprep.mubr.msk.bf16.mxu1 %vm3788_vm0, %v3787_v0 }
 0x80e   :  { %3346 = vmatpush3.bf16.msra.mxu0 %v3715_v15  ;;  %3366 = vmatpush3.bf16.msra.mxu1 %v3716_v1 }
 0x80f   :  { %3347 = vmatprep.subr.bf16.mxu0 %v3787_v0  ;;  %3367 = vmatprep.subr.bf16.mxu1 %v3787_v0 }
 0x812   :  { %3348 = vmatpush3.bf16.msra.mxu0 %v4286_v45  ;;  %3368 = vmatpush3.bf16.msra.mxu1 %v4289_v53 }
 0x813   :  { %3349 = vmatprep.subr.bf16.mxu0 %v3787_v0  ;;  %3369 = vmatprep.subr.bf16.mxu1 %v3787_v0 }
 0x816   :  { %3350 = vmatpush3.bf16.msra.mxu0 %v4294_v51  ;;  %3370 = vmatpush3.bf16.msra.mxu1 %v4297_v46 }
 0x817   :  { %3351 = vmatprep.subr.bf16.mxu0 %v3787_v0  ;;  %3371 = vmatprep.subr.bf16.mxu1 %v3787_v0 }
 0x81a   :  { %3352 = vmatpush3.bf16.msra.mxu0 %v4302_v48  ;;  %3372 = vmatpush3.bf16.msra.mxu1 %v4305_v52 }
 0x81b   :  { %3353 = vmatprep.subr.bf16.mxu0 %v3787_v0  ;;  %3373 = vmatprep.subr.bf16.mxu1 %v3787_v0 }
 0x81e   :  { %3354 = vmatpush3.bf16.msra.mxu0 %v4310_v54  ;;  %3374 = vmatpush3.bf16.msra.mxu1 %v4313_v59 }
 0x81f   :  { %3355 = vmatprep.subr.bf16.mxu0 %v3787_v0  ;;  %3375 = vmatprep.subr.bf16.mxu1 %v3787_v0 }
 0x822   :  { %3356 = vmatpush3.bf16.msra.mxu0 %v4318_v42  ;;  %3376 = vmatpush3.bf16.msra.mxu1 %v4321_v58  ;;  %v2095_v42 = vld [vmem:[#allocation4 + $0xe0] sm:$0xff] }
 0x823   :  { %3357 = vmatprep.subr.bf16.mxu0 %v3787_v0  ;;  %3377 = vmatprep.subr.bf16.mxu1 %v3787_v0  ;;  %v2148_v58 = vrot.slane %v2095_v42, 4  ;;  %v2099_v27 = vunpack.c.l.bf16 %v2095_v42 }
 0x825   :  { %v2152_v41 = vunpack.c.l.bf16 %v2148_v58 }
 0x826   :  { %3358 = vmatpush3.bf16.msra.mxu0 %v4326_v62  ;;  %3378 = vmatpush3.bf16.msra.mxu1 %v4329_v63  ;;  %v2096_v63 = vld [vmem:[#allocation4 + $0xe8] sm:$0xff] }
 0x827   :  { %v2209_v21 = vunpack.c.l.bf16 %v2096_v63  ;;  %v2268_v36 = vrot.slane %v2096_v63, 4 }
 0x829   :  { %3360 = vmatmul.mubr.bf16.vlgmr.msra.gmra.mxu0 %v2093_v10  ;;  %3380 = vmatmul.mubr.bf16.vlgmr.msra.gmra.mxu1 %v2093_v10  ;;  %v2272_v35 = vunpack.c.l.bf16 %v2268_v36 }
 0x8c9   :  { %v2135_v45 = vpop.f32.mrf.mxu0  ;;  %v2188_v53 = vpop.f32.mrf.mxu1 }
 0x8ca   :  { %v2195_v0 = vadd.f32 %v2188_v53, %v2152_v41  ;;  %v2142_v32 = vadd.f32 %v2135_v45, %v2099_v27 }
 0x8cb   :  { %v3321_v51 = vpop.f32.mrf.mxu0  ;;  %v3341_v46 = vpop.f32.mrf.mxu1 }
 0x8cc   :  { %v2449_v62 = vmul.f32 -1.442695, %v2195_v0 }
 0x8cd   :  { %v2138_v48 = vpop.f32.mrf.mxu0  ;;  %v2191_v52 = vpop.f32.mrf.mxu1 }
 0x8ce   :  { %v2196_v50 = vadd.f32 %v2191_v52, %v2153_v18  ;;  %3649 = vpow2.f32 %v2449_v62  ;;  %v2143_v13 = vadd.f32 %v2138_v48, %v2100_v33 }
 0x8cf   :  { %v3322_v54 = vpop.f32.mrf.mxu0  ;;  %v3342_v59 = vpop.f32.mrf.mxu1 }
 0x8d0   :  { %v2450_v60 = vmul.f32 -1.442695, %v2196_v50 }
 0x8d2   :  { %3651 = vpow2.f32 %v2450_v60 }
 0x8db   :  { %v3650_v26 = vpop.eup %3649 }
 0x8dc   :  { %v2203_v30 = vadd.f32 1.0, %v3650_v26 }
 0x8df   :  { %v3652_v31 = vpop.eup %3651 }
 0x8e0   :  { %v2204_v57 = vadd.f32 1.0, %v3652_v31 }
 0x8e9   :  { %v2245_v14 = vpop.f32.mrf.mxu0  ;;  %v2308_v4 = vpop.f32.mrf.mxu1 }
 0x8ea   :  { %v2252_v39 = vadd.f32 %v2245_v14, %v2209_v21  ;;  %v2315_v34 = vadd.f32 %v2308_v4, %v2272_v35 }
 0x8eb   :  { %v3361_v47 = vpop.f32.mrf.mxu0  ;;  %v3381_v38 = vpop.f32.mrf.mxu1 }
 0x8ec   :  { %v2451_v7 = vmul.f32 -1.442695, %v2252_v39  ;;  %v2453_v28 = vmul.f32 -1.442695, %v2315_v34 }
 0x8ed   :  { %v2248_v6 = vpop.f32.mrf.mxu0  ;;  %v2311_v44 = vpop.f32.mrf.mxu1 }
 0x8ee   :  { %3653 = vpow2.f32 %v2451_v7  ;;  %v2253_v3 = vadd.f32 %v2248_v6, %v2210_v2  ;;  %v2316_v29 = vadd.f32 %v2311_v44, %v2273_v25 }
 0x8ef   :  { %v3362_v43 = vpop.f32.mrf.mxu0  ;;  %v3382_v23 = vpop.f32.mrf.mxu1 }
 0x8f0   :  { %v2452_v24 = vmul.f32 -1.442695, %v2253_v3  ;;  %v2454_v61 = vmul.f32 -1.442695, %v2316_v29 }
 0x8f2   :  { %3655 = vpow2.f32 %v2452_v24 }
 0x8f3   :  { %3657 = vpow2.f32 %v2453_v28 }
 0x8f4   :  { %3659 = vrcp.f32 %v2203_v30 }
 0x8f5   :  { %3661 = vtanh.f32 %v2142_v32 }
 0x8fb   :  { %v3654_v56 = vpop.eup %3653 }
 0x8fc   :  { %v2260_v49 = vadd.f32 1.0, %v3654_v56 }
 0x8fe   :  { %3663 = vrcp.f32 %v2260_v49 }
 0x8ff   :  { %v3656_v17 = vpop.eup %3655  ;;  %3665 = vpow2.f32 %v2454_v61 }
 0x900   :  { %3667 = vrcp.f32 %v2204_v57  ;;  %v2261_v12 = vadd.f32 1.0, %v3656_v17  ;;  %v3658_v9 = vpop.eup %3657 }
 0x901   :  { %3669 = vtanh.f32 %v2143_v13  ;;  %v3660_v11 = vpop.eup %3659  ;;  %v2323_v19 = vadd.f32 1.0, %v3658_v9 }
 0x902   :  { %3671 = vrcp.f32 %v2261_v12  ;;  %v3662_v5 = vpop.eup %3661 }
 0x903   :  { %v2329_v15 = vmul.f32 %v3662_v5, %v3660_v11  ;;  %3673 = vrcp.f32 %v2323_v19 }
 0x90b   :  { %v3664_v10 = vpop.eup %3663 }
 0x90c   :  { %v3666_v37 = vpop.eup %3665  ;;  %v2331_v1 = vmul.f32 %v3664_v10, %v4531_v22 }
 0x90d   :  { %v3668_v45 = vpop.eup %3667  ;;  %v2324_v48 = vadd.f32 1.0, %v3666_v37 }
 0x90e   :  { %v3670_v53 = vpop.eup %3669  ;;  %v2333_v51 = vadd.f32 %v2331_v1, %v2329_v15 }
 0x90f   :  { %v3672_v46 = vpop.eup %3671  ;;  %v2330_v52 = vmul.f32 %v3670_v53, %v3668_v45 }
 0x910   :  { %3675 = vtanh.f32 %v2333_v51  ;;  %v2332_v54 = vmul.f32 %v3672_v46, %v4534_v8  ;;  %v3674_v42 = vpop.eup %3673 }
 0x911   :  { %3677 = vrcp.f32 %v2324_v48 }
 0x912   :  { %v2334_v59 = vadd.f32 %v2332_v54, %v2330_v52 }
 0x914   :  { %3679 = vtanh.f32 %v2334_v59 }
 0x91d   :  { %v3676_v58 = vpop.eup %3675 }
 0x91e   :  { %v2337_v20 = vmul.f32 %v3676_v58, %v3674_v42  ;;  %v3678_v41 = vpop.eup %3677 }
 0x920   :  { %2355 = vst [vmem:[#allocation9] sm:$0xff] %v2337_v20 }
 0x921   :  { %v3680_v22 = vpop.eup %3679 }
 0x922   :  { %v2338_v16 = vmul.f32 %v3680_v22, %v3678_v41 }
 0x924   :  { %2356 = vst [vmem:[#allocation9 + $0x8] sm:$0xff] %v2338_v16 }
 0x925   :  { %3768 = shalt.err (!%p3765_p0)
}
 0x926   :  { %s3791_s22 = smov 128   ;;  %s3792_s23 = smov 8  }
 0x927   :  { %2368 = dma.vmem_to_hbm [thread:$0]  %s2363_s1, 256, %s4575_s2, [#allocation6], %s3791_s22, %s3791_s22, %s3792_s23  }
 0x928   :  { %3781 = dma.done.wait [#allocation6], 256  }
 0x929   :  { %3782 = vsyncadd [#allocation6], 4294967040 }
 0x92a   :  { %2372 = vsyncpa [#allocation5], 1 }
 0x92b   :  { %2373 = vsyncpa [#allocation8], 1 }
 0x92c   :  { %2374 = vsyncpa [#allocation6], 1 }

</bundles_post_ra>
